<compile_context>
chip_gen: v6e
topology: v6e:2x2x1
jax: 0.10.0
libtpu: 0.0.40
codegen_flags: <defaults>
</compile_context>

<pallas_src>
import functools
import math

import jax
import jax.numpy as jnp
from jax.experimental import pallas as pl
from jax.experimental.pallas import tpu as pltpu


# ----------------------------- model config (small) -------------------------
IMG = 64          # image size (real model: 384)
PATCH = 16        # patch size (same as real model)
CIN = 3           # input channels
DIM = 128         # embed dim (real model: 768)
HEADS = 4         # attention heads (real model: 12)
HEAD_DIM = DIM // HEADS
DEPTH = 2         # transformer blocks (real model: 12)
MLP = 4 * DIM     # mlp hidden dim
NUM_CLASSES = 10
HEAD_PAD = 128    # classifier output padded to one lane-dense vreg width
LN_EPS = 1e-6

N_PATCHES = (IMG // PATCH) ** 2          # 16
SEQ = N_PATCHES + 1                      # 17 (cls token + patches)
SEQ_PAD = ((SEQ + 7) // 8) * 8           # 24 (sublane-aligned token count)
PATCH_FLAT = CIN * PATCH * PATCH         # 768


def _vmem_limit(args, out_shapes):
    """Derive a per-call VMEM limit from actual operand footprints (+ headroom)."""
    total = 0
    for a in args:
        total += int(a.size) * a.dtype.itemsize
    for s in out_shapes:
        total += math.prod(s.shape) * jnp.dtype(s.dtype).itemsize
    # 2x for double-buffered pipelining + headroom for in-kernel intermediates /
    # Mosaic internal scratch; capped well below v7x's 64 MiB physical VMEM.
    return int(min(32 << 20, max(16 << 20, 2 * total + (8 << 20))))


def _layernorm(x, gamma, beta, eps):
    mu = jnp.mean(x, axis=-1, keepdims=True)
    xc = x - mu
    var = jnp.mean(xc * xc, axis=-1, keepdims=True)
    return xc * jax.lax.rsqrt(var + eps) * gamma + beta


# ------------------------- patch-embed + cls + pos kernel ---------------------
def _embed_kernel(p_ref, w_ref, b_ref, cls_ref, pos_ref, o_ref):
    """One batch element: tokens = [cls | patches@W + b | zero-pad] + pos_embed."""
    tok = jnp.dot(p_ref[0], w_ref[...],
                  preferred_element_type=jnp.float32) + b_ref[...]
    pad = jnp.zeros((SEQ_PAD - SEQ, DIM), jnp.float32)
    seq = jnp.concatenate([cls_ref[...], tok, pad], axis=0)      # (SEQ_PAD, DIM)
    o_ref[0] = seq + pos_ref[...]


def pallas_embed(patches, pw, pb, cls, pos_pad):
    B = patches.shape[0]
    out_shape = jax.ShapeDtypeStruct((B, SEQ_PAD, DIM), jnp.float32)
    args = (patches, pw, pb, cls, pos_pad)
    return pl.pallas_call(
        _embed_kernel,
        out_shape=out_shape,
        grid=(B,),
        in_specs=[
            pl.BlockSpec((1, N_PATCHES, PATCH_FLAT), lambda b: (b, 0, 0)),
            pl.BlockSpec((PATCH_FLAT, DIM), lambda b: (0, 0)),
            pl.BlockSpec((1, DIM), lambda b: (0, 0)),
            pl.BlockSpec((1, DIM), lambda b: (0, 0)),
            pl.BlockSpec((SEQ_PAD, DIM), lambda b: (0, 0)),
        ],
        out_specs=pl.BlockSpec((1, SEQ_PAD, DIM), lambda b: (b, 0, 0)),
        compiler_params=pltpu.CompilerParams(
            dimension_semantics=("parallel",),
            vmem_limit_bytes=_vmem_limit(args, [out_shape])),
    )(*args)


# ------------------------- fused transformer block kernel ---------------------
def _block_kernel(x_ref, g1_ref, bt1_ref, qkvw_ref, qkvb_ref,
                  projw_ref, projb_ref, g2_ref, bt2_ref,
                  fc1w_ref, fc1b_ref, fc2w_ref, fc2b_ref, o_ref,
                  *, heads, head_dim, scale, eps, n_real):
    """Whole transformer block for one batch element, fully VMEM-resident."""
    x = x_ref[0]                                    # (SEQ_PAD, DIM) f32
    dim = heads * head_dim

    # ---- LN1 + fused QKV projection ----
    h = _layernorm(x, g1_ref[...], bt1_ref[...], eps)
    qkv = jnp.dot(h.astype(jnp.bfloat16), qkvw_ref[...],
                  preferred_element_type=jnp.float32) + qkvb_ref[...]
    q = qkv[:, :dim]              # 128-lane-aligned slices of the fused activation
    k = qkv[:, dim:2 * dim]
    v = qkv[:, 2 * dim:]

    # ---- multi-head self-attention, all heads in one grid step ----
    n_pad = x.shape[0]
    key_id = jax.lax.broadcasted_iota(jnp.int32, (n_pad, n_pad), 1)
    key_mask = jnp.where(key_id < n_real, 0.0, -1e30).astype(jnp.float32)
    outs = []
    for hh in range(heads):                         # static loop over heads
        lo = hh * head_dim
        hi = lo + head_dim
        qh = (q[:, lo:hi] * scale).astype(jnp.bfloat16)   # scale folded into q
        kh = k[:, lo:hi].astype(jnp.bfloat16)
        vh = v[:, lo:hi].astype(jnp.bfloat16)
        s = jax.lax.dot_general(qh, kh, (((1,), (1,)), ((), ())),
                                preferred_element_type=jnp.float32) + key_mask
        m = jnp.max(s, axis=-1, keepdims=True)
        p = jnp.exp(s - m)
        p = p / jnp.sum(p, axis=-1, keepdims=True)        # exact normalization
        outs.append(jnp.dot(p.astype(jnp.bfloat16), vh,
                            preferred_element_type=jnp.float32))
    ctx = jnp.concatenate(outs, axis=-1).astype(jnp.bfloat16)    # (SEQ_PAD, DIM)

    # ---- attention output projection + residual (never leaves VMEM) ----
    x = x + jnp.dot(ctx, projw_ref[...],
                    preferred_element_type=jnp.float32) + projb_ref[...]

    # ---- LN2 + MLP + residual ----
    h2 = _layernorm(x, g2_ref[...], bt2_ref[...], eps)
    f = jnp.dot(h2.astype(jnp.bfloat16), fc1w_ref[...],
                preferred_element_type=jnp.float32) + fc1b_ref[...]
    # TODO(synk): timm uses exact erf GELU; tanh-approx GELU used here (small numeric delta).
    f = jax.nn.gelu(f, approximate=True)
    x = x + jnp.dot(f.astype(jnp.bfloat16), fc2w_ref[...],
                    preferred_element_type=jnp.float32) + fc2b_ref[...]

    o_ref[0] = x.astype(o_ref.dtype)


def pallas_block(x, blk):
    B = x.shape[0]
    kern = functools.partial(_block_kernel, heads=HEADS, head_dim=HEAD_DIM,
                             scale=HEAD_DIM ** -0.5, eps=LN_EPS, n_real=SEQ)
    args = (
        x,
        blk["norm1_g"].reshape(1, DIM), blk["norm1_b"].reshape(1, DIM),
        blk["qkv_w"].astype(jnp.bfloat16), blk["qkv_b"].reshape(1, 3 * DIM),
        blk["proj_w"].astype(jnp.bfloat16), blk["proj_b"].reshape(1, DIM),
        blk["norm2_g"].reshape(1, DIM), blk["norm2_b"].reshape(1, DIM),
        blk["fc1_w"].astype(jnp.bfloat16), blk["fc1_b"].reshape(1, MLP),
        blk["fc2_w"].astype(jnp.bfloat16), blk["fc2_b"].reshape(1, DIM),
    )
    out_shape = jax.ShapeDtypeStruct((B, SEQ_PAD, DIM), jnp.float32)

    def wspec(shape):
        return pl.BlockSpec(shape, lambda b: (0, 0))

    in_specs = [
        pl.BlockSpec((1, SEQ_PAD, DIM), lambda b: (b, 0, 0)),   # x
        wspec((1, DIM)), wspec((1, DIM)),                        # norm1 gamma/beta
        wspec((DIM, 3 * DIM)), wspec((1, 3 * DIM)),              # qkv w/b
        wspec((DIM, DIM)), wspec((1, DIM)),                      # proj w/b
        wspec((1, DIM)), wspec((1, DIM)),                        # norm2 gamma/beta
        wspec((DIM, MLP)), wspec((1, MLP)),                      # fc1 w/b
        wspec((MLP, DIM)), wspec((1, DIM)),                      # fc2 w/b
    ]
    return pl.pallas_call(
        kern,
        out_shape=out_shape,
        grid=(B,),
        in_specs=in_specs,
        out_specs=pl.BlockSpec((1, SEQ_PAD, DIM), lambda b: (b, 0, 0)),
        compiler_params=pltpu.CompilerParams(
            dimension_semantics=("parallel",),
            vmem_limit_bytes=_vmem_limit(args, [out_shape])),
    )(*args)


# ----------------------------- final LN + head kernel -------------------------
def _head_kernel(x_ref, g_ref, b_ref, w_ref, hb_ref, o_ref, *, eps):
    h = _layernorm(x_ref[...], g_ref[...], b_ref[...], eps)
    o_ref[...] = (jnp.dot(h.astype(jnp.bfloat16), w_ref[...],
                          preferred_element_type=jnp.float32) + hb_ref[...])


def pallas_head(cls_tok, norm_g, norm_b, head_w_pad, head_b_pad):
    B = cls_tok.shape[0]
    kern = functools.partial(_head_kernel, eps=LN_EPS)
    args = (cls_tok, norm_g.reshape(1, DIM), norm_b.reshape(1, DIM),
            head_w_pad.astype(jnp.bfloat16), head_b_pad.reshape(1, HEAD_PAD))
    out_shape = jax.ShapeDtypeStruct((B, HEAD_PAD), jnp.float32)
    return pl.pallas_call(
        kern,
        out_shape=out_shape,
        grid=(1,),
        in_specs=[
            pl.BlockSpec((B, DIM), lambda i: (0, 0)),
            pl.BlockSpec((1, DIM), lambda i: (0, 0)),
            pl.BlockSpec((1, DIM), lambda i: (0, 0)),
            pl.BlockSpec((DIM, HEAD_PAD), lambda i: (0, 0)),
            pl.BlockSpec((1, HEAD_PAD), lambda i: (0, 0)),
        ],
        out_specs=pl.BlockSpec((B, HEAD_PAD), lambda i: (0, 0)),
        compiler_params=pltpu.CompilerParams(
            dimension_semantics=("arbitrary",),
            vmem_limit_bytes=_vmem_limit(args, [out_shape])),
    )(*args)


# ------------------------------ parameter init -------------------------------
def init_params(key):
    def nrm(k, shape, std=0.02):
        return std * jax.random.normal(k, shape, dtype=jnp.float32)

    keys = iter(jax.random.split(key, 8 + DEPTH * 8))
    params = {
        "patch_w": nrm(next(keys), (DIM, CIN, PATCH, PATCH)),
        "patch_b": jnp.zeros((DIM,), jnp.float32),
        "cls_token": nrm(next(keys), (1, 1, DIM)),
        "pos_embed": nrm(next(keys), (1, SEQ, DIM)),
        "norm_g": jnp.ones((DIM,), jnp.float32),
        "norm_b": jnp.zeros((DIM,), jnp.float32),
        "head_w": nrm(next(keys), (DIM, NUM_CLASSES)),
        "head_b": jnp.zeros((NUM_CLASSES,), jnp.float32),
        "blocks": [],
    }
    for _ in range(DEPTH):
        blk = {
            "norm1_g": jnp.ones((DIM,), jnp.float32),
            "norm1_b": jnp.zeros((DIM,), jnp.float32),
            "qkv_w": nrm(next(keys), (DIM, 3 * DIM)),
            "qkv_b": jnp.zeros((3 * DIM,), jnp.float32),
            "proj_w": nrm(next(keys), (DIM, DIM)),
            "proj_b": jnp.zeros((DIM,), jnp.float32),
            "norm2_g": jnp.ones((DIM,), jnp.float32),
            "norm2_b": jnp.zeros((DIM,), jnp.float32),
            "fc1_w": nrm(next(keys), (DIM, MLP)),
            "fc1_b": jnp.zeros((MLP,), jnp.float32),
            "fc2_w": nrm(next(keys), (MLP, DIM)),
            "fc2_b": jnp.zeros((DIM,), jnp.float32),
        }
        params["blocks"].append(blk)
    return params


# --------------------------------- forward -----------------------------------
def vit_forward(params, x):
    B, C, H, W = x.shape
    nP = (H // PATCH) * (W // PATCH)

    # Patch extraction: conv(k=stride=PATCH) == unfold (plain-JAX reshape) + matmul.
    patches = x.reshape(B, C, H // PATCH, PATCH, W // PATCH, PATCH)
    patches = patches.transpose(0, 2, 4, 1, 3, 5).reshape(B, nP, C * PATCH * PATCH)
    pw = params["patch_w"].reshape(DIM, C * PATCH * PATCH).T        # (C*P*P, DIM)

    pos_pad = jnp.pad(params["pos_embed"][0], ((0, SEQ_PAD - SEQ), (0, 0)))
    xseq = pallas_embed(patches.astype(jnp.bfloat16), pw.astype(jnp.bfloat16),
                        params["patch_b"].reshape(1, DIM),
                        params["cls_token"].reshape(1, DIM),
                        pos_pad)                                     # (B, SEQ_PAD, DIM) f32

    for blk in params["blocks"]:
        xseq = pallas_block(xseq, blk)                               # fused block kernel

    # Final LayerNorm fused with classifier head on the cls token (LN is per-token,
    # so this equals timm's norm-all-tokens-then-select).  Output padded to 128 lanes.
    head_w = jnp.pad(params["head_w"], ((0, 0), (0, HEAD_PAD - NUM_CLASSES)))
    head_b = jnp.pad(params["head_b"], (0, HEAD_PAD - NUM_CLASSES))
    logits = pallas_head(xseq[:, 0, :], params["norm_g"], params["norm_b"],
                         head_w, head_b)
    return logits[:, :NUM_CLASSES]                                   # (B, NUM_CLASSES)


# ----------------------------------- main -------------------------------------
if __name__ == "__main__":
    key = jax.random.PRNGKey(0)
    k_in, k_params = jax.random.split(key)

    B = 2
    x = jax.random.normal(k_in, (B, CIN, IMG, IMG), dtype=jnp.float32)   # NCHW
    params = init_params(k_params)

    fwd = jax.jit(vit_forward)
    out = fwd(params, x)
    out = jax.block_until_ready(out)

    assert out.shape == (B, NUM_CLASSES), out.shape
    assert bool(jnp.all(jnp.isfinite(out)))
    print("KERNEL_OK")
</pallas_src>

<mosaic_0001>
module attributes {stable_mosaic.version = 11 : i64} {
  func.func @_embed_kernel(%arg0: i32, %arg1: memref<1x16x768xbf16, #tpu.memory_space<vmem>>, %arg2: memref<768x128xbf16, #tpu.memory_space<vmem>>, %arg3: memref<1x128xf32, #tpu.memory_space<vmem>>, %arg4: memref<1x128xf32, #tpu.memory_space<vmem>>, %arg5: memref<24x128xf32, #tpu.memory_space<vmem>>, %arg6: memref<1x24x128xf32, #tpu.memory_space<vmem>>) attributes {dimension_semantics = [#tpu.dimension_semantics<parallel>], iteration_bounds = array<i64: 2>, scalar_prefetch = 0 : i64, scratch_operands = 0 : i64, tpu.core_type = #tpu.core_type<tc>, window_params = [{transform_indices = @transform_0, window_bounds = array<i64: 1, 16, 768>}, {pipeline_mode = #tpu.pipeline_mode<synchronous>, transform_indices = @transform_1, window_bounds = array<i64: 768, 128>}, {pipeline_mode = #tpu.pipeline_mode<synchronous>, transform_indices = @transform_2, window_bounds = array<i64: 1, 128>}, {pipeline_mode = #tpu.pipeline_mode<synchronous>, transform_indices = @transform_3, window_bounds = array<i64: 1, 128>}, {pipeline_mode = #tpu.pipeline_mode<synchronous>, transform_indices = @transform_4, window_bounds = array<i64: 24, 128>}, {transform_indices = @transform_5, window_bounds = array<i64: 1, 24, 128>}]} {
    %c0 = arith.constant 0 : index
    %c0_0 = arith.constant 0 : index
    %c0_1 = arith.constant 0 : index
    %0 = vector.load %arg1[%c0, %c0_0, %c0_1] : memref<1x16x768xbf16, #tpu.memory_space<vmem>>, vector<1x16x768xbf16>
    %1 = vector.shape_cast %0 : vector<1x16x768xbf16> to vector<16x768xbf16>
    %c0_2 = arith.constant 0 : index
    %c0_3 = arith.constant 0 : index
    %2 = vector.load %arg2[%c0_2, %c0_3] : memref<768x128xbf16, #tpu.memory_space<vmem>>, vector<768x128xbf16>
    %cst = arith.constant dense<0.000000e+00> : vector<16x128xf32>
    %3 = tpu.matmul %1, %2, %cst {dimension_numbers = #tpu.dot_dimension_numbers<[1], [0], [0], [1], [0, 0, 1, 1], [], []>} : vector<16x768xbf16>, vector<768x128xbf16>, vector<16x128xf32> -> vector<16x128xf32>
    %c0_4 = arith.constant 0 : index
    %c0_5 = arith.constant 0 : index
    %4 = vector.load %arg3[%c0_4, %c0_5] : memref<1x128xf32, #tpu.memory_space<vmem>>, vector<1x128xf32>
    %5 = vector.broadcast %4 : vector<1x128xf32> to vector<16x128xf32>
    %6 = arith.addf %3, %5 : vector<16x128xf32>
    %cst_6 = arith.constant 0.000000e+00 : f32
    %7 = vector.broadcast %cst_6 : f32 to vector<7x128xf32>
    %c0_7 = arith.constant 0 : index
    %c0_8 = arith.constant 0 : index
    %8 = vector.load %arg4[%c0_7, %c0_8] : memref<1x128xf32, #tpu.memory_space<vmem>>, vector<1x128xf32>
    %9 = tpu.concatenate %8, %6, %7 in 0 : vector<1x128xf32>, vector<16x128xf32>, vector<7x128xf32> -> vector<24x128xf32>
    %c0_9 = arith.constant 0 : index
    %c0_10 = arith.constant 0 : index
    %10 = vector.load %arg5[%c0_9, %c0_10] : memref<24x128xf32, #tpu.memory_space<vmem>>, vector<24x128xf32>
    %11 = arith.addf %9, %10 : vector<24x128xf32>
    %c0_11 = arith.constant 0 : index
    %c0_12 = arith.constant 0 : index
    %c0_13 = arith.constant 0 : index
    %12 = vector.load %arg6[%c0_11, %c0_12, %c0_13] : memref<1x24x128xf32, #tpu.memory_space<vmem>>, vector<1x24x128xf32>
    %13 = vector.shape_cast %12 : vector<1x24x128xf32> to vector<24x128xf32>
    %14 = vector.shape_cast %11 : vector<24x128xf32> to vector<1x24x128xf32>
    tpu.vector_store %arg6[%c0_11, %c0_12, %c0_13], %14 {strides = array<i32>} : memref<1x24x128xf32, #tpu.memory_space<vmem>>, vector<1x24x128xf32>,
    return
  }
  func.func @transform_0(%arg0: i32) -> (i32, i32, i32) {
    %c0_i32 = arith.constant 0 : i32
    %c0_i32_0 = arith.constant 0 : i32
    %c0_i32_1 = arith.constant 0 : i32
    return %arg0, %c0_i32, %c0_i32_0 : i32, i32, i32
  }
  func.func @transform_1(%arg0: i32) -> (i32, i32) {
    %c0_i32 = arith.constant 0 : i32
    %c0_i32_0 = arith.constant 0 : i32
    %c0_i32_1 = arith.constant 0 : i32
    return %c0_i32, %c0_i32_0 : i32, i32
  }
  func.func @transform_2(%arg0: i32) -> (i32, i32) {
    %c0_i32 = arith.constant 0 : i32
    %c0_i32_0 = arith.constant 0 : i32
    %c0_i32_1 = arith.constant 0 : i32
    return %c0_i32, %c0_i32_0 : i32, i32
  }
  func.func @transform_3(%arg0: i32) -> (i32, i32) {
    %c0_i32 = arith.constant 0 : i32
    %c0_i32_0 = arith.constant 0 : i32
    %c0_i32_1 = arith.constant 0 : i32
    return %c0_i32, %c0_i32_0 : i32, i32
  }
  func.func @transform_4(%arg0: i32) -> (i32, i32) {
    %c0_i32 = arith.constant 0 : i32
    %c0_i32_0 = arith.constant 0 : i32
    %c0_i32_1 = arith.constant 0 : i32
    return %c0_i32, %c0_i32_0 : i32, i32
  }
  func.func @transform_5(%arg0: i32) -> (i32, i32, i32) {
    %c0_i32 = arith.constant 0 : i32
    %c0_i32_0 = arith.constant 0 : i32
    %c0_i32_1 = arith.constant 0 : i32
    return %arg0, %c0_i32, %c0_i32_0 : i32, i32, i32
  }
}

module attributes {stable_mosaic.version = 11 : i64} {
  func.func @_block_kernel(%arg0: i32, %arg1: memref<1x24x128xf32, #tpu.memory_space<vmem>>, %arg2: memref<1x128xf32, #tpu.memory_space<vmem>>, %arg3: memref<1x128xf32, #tpu.memory_space<vmem>>, %arg4: memref<128x384xbf16, #tpu.memory_space<vmem>>, %arg5: memref<1x384xf32, #tpu.memory_space<vmem>>, %arg6: memref<128x128xbf16, #tpu.memory_space<vmem>>, %arg7: memref<1x128xf32, #tpu.memory_space<vmem>>, %arg8: memref<1x128xf32, #tpu.memory_space<vmem>>, %arg9: memref<1x128xf32, #tpu.memory_space<vmem>>, %arg10: memref<128x512xbf16, #tpu.memory_space<vmem>>, %arg11: memref<1x512xf32, #tpu.memory_space<vmem>>, %arg12: memref<512x128xbf16, #tpu.memory_space<vmem>>, %arg13: memref<1x128xf32, #tpu.memory_space<vmem>>, %arg14: memref<1x24x128xf32, #tpu.memory_space<vmem>>) attributes {dimension_semantics = [#tpu.dimension_semantics<parallel>], iteration_bounds = array<i64: 2>, scalar_prefetch = 0 : i64, scratch_operands = 0 : i64, tpu.core_type = #tpu.core_type<tc>, window_params = [{transform_indices = @transform_0, window_bounds = array<i64: 1, 24, 128>}, {pipeline_mode = #tpu.pipeline_mode<synchronous>, transform_indices = @transform_1, window_bounds = array<i64: 1, 128>}, {pipeline_mode = #tpu.pipeline_mode<synchronous>, transform_indices = @transform_2, window_bounds = array<i64: 1, 128>}, {pipeline_mode = #tpu.pipeline_mode<synchronous>, transform_indices = @transform_3, window_bounds = array<i64: 128, 384>}, {pipeline_mode = #tpu.pipeline_mode<synchronous>, transform_indices = @transform_4, window_bounds = array<i64: 1, 384>}, {pipeline_mode = #tpu.pipeline_mode<synchronous>, transform_indices = @transform_5, window_bounds = array<i64: 128, 128>}, {pipeline_mode = #tpu.pipeline_mode<synchronous>, transform_indices = @transform_6, window_bounds = array<i64: 1, 128>}, {pipeline_mode = #tpu.pipeline_mode<synchronous>, transform_indices = @transform_7, window_bounds = array<i64: 1, 128>}, {pipeline_mode = #tpu.pipeline_mode<synchronous>, transform_indices = @transform_8, window_bounds = array<i64: 1, 128>}, {pipeline_mode = #tpu.pipeline_mode<synchronous>, transform_indices = @transform_9, window_bounds = array<i64: 128, 512>}, {pipeline_mode = #tpu.pipeline_mode<synchronous>, transform_indices = @transform_10, window_bounds = array<i64: 1, 512>}, {pipeline_mode = #tpu.pipeline_mode<synchronous>, transform_indices = @transform_11, window_bounds = array<i64: 512, 128>}, {pipeline_mode = #tpu.pipeline_mode<synchronous>, transform_indices = @transform_12, window_bounds = array<i64: 1, 128>}, {transform_indices = @transform_13, window_bounds = array<i64: 1, 24, 128>}]} {
    %c0 = arith.constant 0 : index
    %c0_0 = arith.constant 0 : index
    %c0_1 = arith.constant 0 : index
    %0 = vector.load %arg1[%c0, %c0_0, %c0_1] : memref<1x24x128xf32, #tpu.memory_space<vmem>>, vector<1x24x128xf32>
    %1 = vector.shape_cast %0 : vector<1x24x128xf32> to vector<24x128xf32>
    %c0_2 = arith.constant 0 : index
    %c0_3 = arith.constant 0 : index
    %2 = vector.load %arg2[%c0_2, %c0_3] : memref<1x128xf32, #tpu.memory_space<vmem>>, vector<1x128xf32>
    %c0_4 = arith.constant 0 : index
    %c0_5 = arith.constant 0 : index
    %3 = vector.load %arg3[%c0_4, %c0_5] : memref<1x128xf32, #tpu.memory_space<vmem>>, vector<1x128xf32>
    %cst = arith.constant dense<0.000000e+00> : vector<24xf32>
    %4 = vector.multi_reduction <add>, %1, %cst [1] : vector<24x128xf32> to vector<24xf32>
    %5 = vector.shape_cast %4 : vector<24xf32> to vector<24x1xf32>
    %cst_6 = arith.constant 1.280000e+02 : f32
    %6 = vector.broadcast %cst_6 : f32 to vector<24x1xf32>
    %7 = arith.divf %5, %6 : vector<24x1xf32>
    %8 = vector.broadcast %7 : vector<24x1xf32> to vector<24x128xf32>
    %9 = arith.subf %1, %8 : vector<24x128xf32>
    %10 = arith.mulf %9, %9 : vector<24x128xf32>
    %cst_7 = arith.constant dense<0.000000e+00> : vector<24xf32>
    %11 = vector.multi_reduction <add>, %10, %cst_7 [1] : vector<24x128xf32> to vector<24xf32>
    %12 = vector.shape_cast %11 : vector<24xf32> to vector<24x1xf32>
    %cst_8 = arith.constant 1.280000e+02 : f32
    %13 = vector.broadcast %cst_8 : f32 to vector<24x1xf32>
    %14 = arith.divf %12, %13 : vector<24x1xf32>
    %cst_9 = arith.constant 9.99999997E-7 : f32
    %15 = vector.broadcast %cst_9 : f32 to vector<24x1xf32>
    %16 = arith.addf %14, %15 : vector<24x1xf32>
    %17 = math.rsqrt %16 : vector<24x1xf32>
    %18 = vector.broadcast %17 : vector<24x1xf32> to vector<24x128xf32>
    %19 = arith.mulf %9, %18 : vector<24x128xf32>
    %20 = vector.broadcast %2 : vector<1x128xf32> to vector<24x128xf32>
    %21 = arith.mulf %19, %20 : vector<24x128xf32>
    %22 = vector.broadcast %3 : vector<1x128xf32> to vector<24x128xf32>
    %23 = arith.addf %21, %22 : vector<24x128xf32>
    %24 = arith.truncf %23 : vector<24x128xf32> to vector<24x128xbf16>
    %c0_10 = arith.constant 0 : index
    %c0_11 = arith.constant 0 : index
    %25 = vector.load %arg4[%c0_10, %c0_11] : memref<128x384xbf16, #tpu.memory_space<vmem>>, vector<128x384xbf16>
    %cst_12 = arith.constant dense<0.000000e+00> : vector<24x384xf32>
    %26 = tpu.matmul %24, %25, %cst_12 {dimension_numbers = #tpu.dot_dimension_numbers<[1], [0], [0], [1], [0, 0, 1, 1], [], []>} : vector<24x128xbf16>, vector<128x384xbf16>, vector<24x384xf32> -> vector<24x384xf32>
    %c0_13 = arith.constant 0 : index
    %c0_14 = arith.constant 0 : index
    %27 = vector.load %arg5[%c0_13, %c0_14] : memref<1x384xf32, #tpu.memory_space<vmem>>, vector<1x384xf32>
    %28 = vector.broadcast %27 : vector<1x384xf32> to vector<24x384xf32>
    %29 = arith.addf %26, %28 : vector<24x384xf32>
    %30 = vector.extract_strided_slice %29 {offsets = [0, 0], sizes = [24, 128], strides = [1, 1]} : vector<24x384xf32> to vector<24x128xf32>
    %31 = vector.extract_strided_slice %29 {offsets = [0, 128], sizes = [24, 128], strides = [1, 1]} : vector<24x384xf32> to vector<24x128xf32>
    %32 = vector.extract_strided_slice %29 {offsets = [0, 256], sizes = [24, 128], strides = [1, 1]} : vector<24x384xf32> to vector<24x128xf32>
    %33 = tpu.iota {dimensions = array<i32: 1>} : vector<24x24xi32>
    %c17_i32 = arith.constant 17 : i32
    %34 = vector.broadcast %c17_i32 : i32 to vector<24x24xi32>
    %35 = arith.cmpi slt, %33, %34 : vector<24x24xi32>
    %cst_15 = arith.constant 0.000000e+00 : f32
    %cst_16 = arith.constant -1.000000e+30 : f32
    %36 = vector.broadcast %cst_15 : f32 to vector<24x24xf32>
    %37 = vector.broadcast %cst_16 : f32 to vector<24x24xf32>
    %38 = arith.select %35, %36, %37 : vector<24x24xi1>, vector<24x24xf32>
    %39 = vector.extract_strided_slice %30 {offsets = [0, 0], sizes = [24, 32], strides = [1, 1]} : vector<24x128xf32> to vector<24x32xf32>
    %cst_17 = arith.constant 0.176776692 : f32
    %40 = vector.broadcast %cst_17 : f32 to vector<24x32xf32>
    %41 = arith.mulf %39, %40 : vector<24x32xf32>
    %42 = arith.truncf %41 : vector<24x32xf32> to vector<24x32xbf16>
    %43 = vector.extract_strided_slice %31 {offsets = [0, 0], sizes = [24, 32], strides = [1, 1]} : vector<24x128xf32> to vector<24x32xf32>
    %44 = arith.truncf %43 : vector<24x32xf32> to vector<24x32xbf16>
    %45 = vector.extract_strided_slice %32 {offsets = [0, 0], sizes = [24, 32], strides = [1, 1]} : vector<24x128xf32> to vector<24x32xf32>
    %46 = arith.truncf %45 : vector<24x32xf32> to vector<24x32xbf16>
    %cst_18 = arith.constant dense<0.000000e+00> : vector<24x24xf32>
    %47 = tpu.matmul %42, %44, %cst_18 {dimension_numbers = #tpu.dot_dimension_numbers<[1], [1], [0], [0], [0, 0, 1, 0], [], []>} : vector<24x32xbf16>, vector<24x32xbf16>, vector<24x24xf32> -> vector<24x24xf32>
    %48 = arith.addf %47, %38 : vector<24x24xf32>
    %cst_19 = arith.constant dense<0xFF800000> : vector<24xf32>
    %49 = vector.multi_reduction <maximumf>, %48, %cst_19 [1] : vector<24x24xf32> to vector<24xf32>
    %50 = vector.shape_cast %49 : vector<24xf32> to vector<24x1xf32>
    %51 = vector.broadcast %50 : vector<24x1xf32> to vector<24x24xf32>
    %52 = arith.subf %48, %51 : vector<24x24xf32>
    %53 = math.exp %52 : vector<24x24xf32>
    %cst_20 = arith.constant dense<0.000000e+00> : vector<24xf32>
    %54 = vector.multi_reduction <add>, %53, %cst_20 [1] : vector<24x24xf32> to vector<24xf32>
    %55 = vector.shape_cast %54 : vector<24xf32> to vector<24x1xf32>
    %56 = vector.broadcast %55 : vector<24x1xf32> to vector<24x24xf32>
    %57 = arith.divf %53, %56 : vector<24x24xf32>
    %58 = arith.truncf %57 : vector<24x24xf32> to vector<24x24xbf16>
    %cst_21 = arith.constant dense<0.000000e+00> : vector<24x32xf32>
    %59 = tpu.matmul %58, %46, %cst_21 {dimension_numbers = #tpu.dot_dimension_numbers<[1], [0], [0], [1], [0, 0, 1, 1], [], []>} : vector<24x24xbf16>, vector<24x32xbf16>, vector<24x32xf32> -> vector<24x32xf32>
    %60 = vector.extract_strided_slice %30 {offsets = [0, 32], sizes = [24, 32], strides = [1, 1]} : vector<24x128xf32> to vector<24x32xf32>
    %cst_22 = arith.constant 0.176776692 : f32
    %61 = vector.broadcast %cst_22 : f32 to vector<24x32xf32>
    %62 = arith.mulf %60, %61 : vector<24x32xf32>
    %63 = arith.truncf %62 : vector<24x32xf32> to vector<24x32xbf16>
    %64 = vector.extract_strided_slice %31 {offsets = [0, 32], sizes = [24, 32], strides = [1, 1]} : vector<24x128xf32> to vector<24x32xf32>
    %65 = arith.truncf %64 : vector<24x32xf32> to vector<24x32xbf16>
    %66 = vector.extract_strided_slice %32 {offsets = [0, 32], sizes = [24, 32], strides = [1, 1]} : vector<24x128xf32> to vector<24x32xf32>
    %67 = arith.truncf %66 : vector<24x32xf32> to vector<24x32xbf16>
    %cst_23 = arith.constant dense<0.000000e+00> : vector<24x24xf32>
    %68 = tpu.matmul %63, %65, %cst_23 {dimension_numbers = #tpu.dot_dimension_numbers<[1], [1], [0], [0], [0, 0, 1, 0], [], []>} : vector<24x32xbf16>, vector<24x32xbf16>, vector<24x24xf32> -> vector<24x24xf32>
    %69 = arith.addf %68, %38 : vector<24x24xf32>
    %cst_24 = arith.constant dense<0xFF800000> : vector<24xf32>
    %70 = vector.multi_reduction <maximumf>, %69, %cst_24 [1] : vector<24x24xf32> to vector<24xf32>
    %71 = vector.shape_cast %70 : vector<24xf32> to vector<24x1xf32>
    %72 = vector.broadcast %71 : vector<24x1xf32> to vector<24x24xf32>
    %73 = arith.subf %69, %72 : vector<24x24xf32>
    %74 = math.exp %73 : vector<24x24xf32>
    %cst_25 = arith.constant dense<0.000000e+00> : vector<24xf32>
    %75 = vector.multi_reduction <add>, %74, %cst_25 [1] : vector<24x24xf32> to vector<24xf32>
    %76 = vector.shape_cast %75 : vector<24xf32> to vector<24x1xf32>
    %77 = vector.broadcast %76 : vector<24x1xf32> to vector<24x24xf32>
    %78 = arith.divf %74, %77 : vector<24x24xf32>
    %79 = arith.truncf %78 : vector<24x24xf32> to vector<24x24xbf16>
    %cst_26 = arith.constant dense<0.000000e+00> : vector<24x32xf32>
    %80 = tpu.matmul %79, %67, %cst_26 {dimension_numbers = #tpu.dot_dimension_numbers<[1], [0], [0], [1], [0, 0, 1, 1], [], []>} : vector<24x24xbf16>, vector<24x32xbf16>, vector<24x32xf32> -> vector<24x32xf32>
    %81 = vector.extract_strided_slice %30 {offsets = [0, 64], sizes = [24, 32], strides = [1, 1]} : vector<24x128xf32> to vector<24x32xf32>
    %cst_27 = arith.constant 0.176776692 : f32
    %82 = vector.broadcast %cst_27 : f32 to vector<24x32xf32>
    %83 = arith.mulf %81, %82 : vector<24x32xf32>
    %84 = arith.truncf %83 : vector<24x32xf32> to vector<24x32xbf16>
    %85 = vector.extract_strided_slice %31 {offsets = [0, 64], sizes = [24, 32], strides = [1, 1]} : vector<24x128xf32> to vector<24x32xf32>
    %86 = arith.truncf %85 : vector<24x32xf32> to vector<24x32xbf16>
    %87 = vector.extract_strided_slice %32 {offsets = [0, 64], sizes = [24, 32], strides = [1, 1]} : vector<24x128xf32> to vector<24x32xf32>
    %88 = arith.truncf %87 : vector<24x32xf32> to vector<24x32xbf16>
    %cst_28 = arith.constant dense<0.000000e+00> : vector<24x24xf32>
    %89 = tpu.matmul %84, %86, %cst_28 {dimension_numbers = #tpu.dot_dimension_numbers<[1], [1], [0], [0], [0, 0, 1, 0], [], []>} : vector<24x32xbf16>, vector<24x32xbf16>, vector<24x24xf32> -> vector<24x24xf32>
    %90 = arith.addf %89, %38 : vector<24x24xf32>
    %cst_29 = arith.constant dense<0xFF800000> : vector<24xf32>
    %91 = vector.multi_reduction <maximumf>, %90, %cst_29 [1] : vector<24x24xf32> to vector<24xf32>
    %92 = vector.shape_cast %91 : vector<24xf32> to vector<24x1xf32>
    %93 = vector.broadcast %92 : vector<24x1xf32> to vector<24x24xf32>
    %94 = arith.subf %90, %93 : vector<24x24xf32>
    %95 = math.exp %94 : vector<24x24xf32>
    %cst_30 = arith.constant dense<0.000000e+00> : vector<24xf32>
    %96 = vector.multi_reduction <add>, %95, %cst_30 [1] : vector<24x24xf32> to vector<24xf32>
    %97 = vector.shape_cast %96 : vector<24xf32> to vector<24x1xf32>
    %98 = vector.broadcast %97 : vector<24x1xf32> to vector<24x24xf32>
    %99 = arith.divf %95, %98 : vector<24x24xf32>
    %100 = arith.truncf %99 : vector<24x24xf32> to vector<24x24xbf16>
    %cst_31 = arith.constant dense<0.000000e+00> : vector<24x32xf32>
    %101 = tpu.matmul %100, %88, %cst_31 {dimension_numbers = #tpu.dot_dimension_numbers<[1], [0], [0], [1], [0, 0, 1, 1], [], []>} : vector<24x24xbf16>, vector<24x32xbf16>, vector<24x32xf32> -> vector<24x32xf32>
    %102 = vector.extract_strided_slice %30 {offsets = [0, 96], sizes = [24, 32], strides = [1, 1]} : vector<24x128xf32> to vector<24x32xf32>
    %cst_32 = arith.constant 0.176776692 : f32
    %103 = vector.broadcast %cst_32 : f32 to vector<24x32xf32>
    %104 = arith.mulf %102, %103 : vector<24x32xf32>
    %105 = arith.truncf %104 : vector<24x32xf32> to vector<24x32xbf16>
    %106 = vector.extract_strided_slice %31 {offsets = [0, 96], sizes = [24, 32], strides = [1, 1]} : vector<24x128xf32> to vector<24x32xf32>
    %107 = arith.truncf %106 : vector<24x32xf32> to vector<24x32xbf16>
    %108 = vector.extract_strided_slice %32 {offsets = [0, 96], sizes = [24, 32], strides = [1, 1]} : vector<24x128xf32> to vector<24x32xf32>
    %109 = arith.truncf %108 : vector<24x32xf32> to vector<24x32xbf16>
    %cst_33 = arith.constant dense<0.000000e+00> : vector<24x24xf32>
    %110 = tpu.matmul %105, %107, %cst_33 {dimension_numbers = #tpu.dot_dimension_numbers<[1], [1], [0], [0], [0, 0, 1, 0], [], []>} : vector<24x32xbf16>, vector<24x32xbf16>, vector<24x24xf32> -> vector<24x24xf32>
    %111 = arith.addf %110, %38 : vector<24x24xf32>
    %cst_34 = arith.constant dense<0xFF800000> : vector<24xf32>
    %112 = vector.multi_reduction <maximumf>, %111, %cst_34 [1] : vector<24x24xf32> to vector<24xf32>
    %113 = vector.shape_cast %112 : vector<24xf32> to vector<24x1xf32>
    %114 = vector.broadcast %113 : vector<24x1xf32> to vector<24x24xf32>
    %115 = arith.subf %111, %114 : vector<24x24xf32>
    %116 = math.exp %115 : vector<24x24xf32>
    %cst_35 = arith.constant dense<0.000000e+00> : vector<24xf32>
    %117 = vector.multi_reduction <add>, %116, %cst_35 [1] : vector<24x24xf32> to vector<24xf32>
    %118 = vector.shape_cast %117 : vector<24xf32> to vector<24x1xf32>
    %119 = vector.broadcast %118 : vector<24x1xf32> to vector<24x24xf32>
    %120 = arith.divf %116, %119 : vector<24x24xf32>
    %121 = arith.truncf %120 : vector<24x24xf32> to vector<24x24xbf16>
    %cst_36 = arith.constant dense<0.000000e+00> : vector<24x32xf32>
    %122 = tpu.matmul %121, %109, %cst_36 {dimension_numbers = #tpu.dot_dimension_numbers<[1], [0], [0], [1], [0, 0, 1, 1], [], []>} : vector<24x24xbf16>, vector<24x32xbf16>, vector<24x32xf32> -> vector<24x32xf32>
    %123 = tpu.concatenate %59, %80, %101, %122 in 1 : vector<24x32xf32>, vector<24x32xf32>, vector<24x32xf32>, vector<24x32xf32> -> vector<24x128xf32>
    %124 = arith.truncf %123 : vector<24x128xf32> to vector<24x128xbf16>
    %c0_37 = arith.constant 0 : index
    %c0_38 = arith.constant 0 : index
    %125 = vector.load %arg6[%c0_37, %c0_38] : memref<128x128xbf16, #tpu.memory_space<vmem>>, vector<128x128xbf16>
    %cst_39 = arith.constant dense<0.000000e+00> : vector<24x128xf32>
    %126 = tpu.matmul %124, %125, %cst_39 {dimension_numbers = #tpu.dot_dimension_numbers<[1], [0], [0], [1], [0, 0, 1, 1], [], []>} : vector<24x128xbf16>, vector<128x128xbf16>, vector<24x128xf32> -> vector<24x128xf32>
    %127 = arith.addf %1, %126 : vector<24x128xf32>
    %c0_40 = arith.constant 0 : index
    %c0_41 = arith.constant 0 : index
    %128 = vector.load %arg7[%c0_40, %c0_41] : memref<1x128xf32, #tpu.memory_space<vmem>>, vector<1x128xf32>
    %129 = vector.broadcast %128 : vector<1x128xf32> to vector<24x128xf32>
    %130 = arith.addf %127, %129 : vector<24x128xf32>
    %c0_42 = arith.constant 0 : index
    %c0_43 = arith.constant 0 : index
    %131 = vector.load %arg8[%c0_42, %c0_43] : memref<1x128xf32, #tpu.memory_space<vmem>>, vector<1x128xf32>
    %c0_44 = arith.constant 0 : index
    %c0_45 = arith.constant 0 : index
    %132 = vector.load %arg9[%c0_44, %c0_45] : memref<1x128xf32, #tpu.memory_space<vmem>>, vector<1x128xf32>
    %cst_46 = arith.constant dense<0.000000e+00> : vector<24xf32>
    %133 = vector.multi_reduction <add>, %130, %cst_46 [1] : vector<24x128xf32> to vector<24xf32>
    %134 = vector.shape_cast %133 : vector<24xf32> to vector<24x1xf32>
    %cst_47 = arith.constant 1.280000e+02 : f32
    %135 = vector.broadcast %cst_47 : f32 to vector<24x1xf32>
    %136 = arith.divf %134, %135 : vector<24x1xf32>
    %137 = vector.broadcast %136 : vector<24x1xf32> to vector<24x128xf32>
    %138 = arith.subf %130, %137 : vector<24x128xf32>
    %139 = arith.mulf %138, %138 : vector<24x128xf32>
    %cst_48 = arith.constant dense<0.000000e+00> : vector<24xf32>
    %140 = vector.multi_reduction <add>, %139, %cst_48 [1] : vector<24x128xf32> to vector<24xf32>
    %141 = vector.shape_cast %140 : vector<24xf32> to vector<24x1xf32>
    %cst_49 = arith.constant 1.280000e+02 : f32
    %142 = vector.broadcast %cst_49 : f32 to vector<24x1xf32>
    %143 = arith.divf %141, %142 : vector<24x1xf32>
    %cst_50 = arith.constant 9.99999997E-7 : f32
    %144 = vector.broadcast %cst_50 : f32 to vector<24x1xf32>
    %145 = arith.addf %143, %144 : vector<24x1xf32>
    %146 = math.rsqrt %145 : vector<24x1xf32>
    %147 = vector.broadcast %146 : vector<24x1xf32> to vector<24x128xf32>
    %148 = arith.mulf %138, %147 : vector<24x128xf32>
    %149 = vector.broadcast %131 : vector<1x128xf32> to vector<24x128xf32>
    %150 = arith.mulf %148, %149 : vector<24x128xf32>
    %151 = vector.broadcast %132 : vector<1x128xf32> to vector<24x128xf32>
    %152 = arith.addf %150, %151 : vector<24x128xf32>
    %153 = arith.truncf %152 : vector<24x128xf32> to vector<24x128xbf16>
    %c0_51 = arith.constant 0 : index
    %c0_52 = arith.constant 0 : index
    %154 = vector.load %arg10[%c0_51, %c0_52] : memref<128x512xbf16, #tpu.memory_space<vmem>>, vector<128x512xbf16>
    %cst_53 = arith.constant dense<0.000000e+00> : vector<24x512xf32>
    %155 = tpu.matmul %153, %154, %cst_53 {dimension_numbers = #tpu.dot_dimension_numbers<[1], [0], [0], [1], [0, 0, 1, 1], [], []>} : vector<24x128xbf16>, vector<128x512xbf16>, vector<24x512xf32> -> vector<24x512xf32>
    %c0_54 = arith.constant 0 : index
    %c0_55 = arith.constant 0 : index
    %156 = vector.load %arg11[%c0_54, %c0_55] : memref<1x512xf32, #tpu.memory_space<vmem>>, vector<1x512xf32>
    %157 = vector.broadcast %156 : vector<1x512xf32> to vector<24x512xf32>
    %158 = arith.addf %155, %157 : vector<24x512xf32>
    %159 = arith.mulf %158, %158 : vector<24x512xf32>
    %160 = arith.mulf %158, %159 : vector<24x512xf32>
    %cst_56 = arith.constant 4.471500e-02 : f32
    %161 = vector.broadcast %cst_56 : f32 to vector<24x512xf32>
    %162 = arith.mulf %161, %160 : vector<24x512xf32>
    %163 = arith.addf %158, %162 : vector<24x512xf32>
    %cst_57 = arith.constant 0.797884583 : f32
    %164 = vector.broadcast %cst_57 : f32 to vector<24x512xf32>
    %165 = arith.mulf %164, %163 : vector<24x512xf32>
    %166 = math.tanh %165 : vector<24x512xf32>
    %cst_58 = arith.constant 1.000000e+00 : f32
    %167 = vector.broadcast %cst_58 : f32 to vector<24x512xf32>
    %168 = arith.addf %167, %166 : vector<24x512xf32>
    %cst_59 = arith.constant 5.000000e-01 : f32
    %169 = vector.broadcast %cst_59 : f32 to vector<24x512xf32>
    %170 = arith.mulf %169, %168 : vector<24x512xf32>
    %171 = arith.mulf %158, %170 : vector<24x512xf32>
    %172 = arith.truncf %171 : vector<24x512xf32> to vector<24x512xbf16>
    %c0_60 = arith.constant 0 : index
    %c0_61 = arith.constant 0 : index
    %173 = vector.load %arg12[%c0_60, %c0_61] : memref<512x128xbf16, #tpu.memory_space<vmem>>, vector<512x128xbf16>
    %cst_62 = arith.constant dense<0.000000e+00> : vector<24x128xf32>
    %174 = tpu.matmul %172, %173, %cst_62 {dimension_numbers = #tpu.dot_dimension_numbers<[1], [0], [0], [1], [0, 0, 1, 1], [], []>} : vector<24x512xbf16>, vector<512x128xbf16>, vector<24x128xf32> -> vector<24x128xf32>
    %175 = arith.addf %130, %174 : vector<24x128xf32>
    %c0_63 = arith.constant 0 : index
    %c0_64 = arith.constant 0 : index
    %176 = vector.load %arg13[%c0_63, %c0_64] : memref<1x128xf32, #tpu.memory_space<vmem>>, vector<1x128xf32>
    %177 = vector.broadcast %176 : vector<1x128xf32> to vector<24x128xf32>
    %178 = arith.addf %175, %177 : vector<24x128xf32>
    %c0_65 = arith.constant 0 : index
    %c0_66 = arith.constant 0 : index
    %c0_67 = arith.constant 0 : index
    %179 = vector.load %arg14[%c0_65, %c0_66, %c0_67] : memref<1x24x128xf32, #tpu.memory_space<vmem>>, vector<1x24x128xf32>
    %180 = vector.shape_cast %179 : vector<1x24x128xf32> to vector<24x128xf32>
    %181 = vector.shape_cast %178 : vector<24x128xf32> to vector<1x24x128xf32>
    tpu.vector_store %arg14[%c0_65, %c0_66, %c0_67], %181 {strides = array<i32>} : memref<1x24x128xf32, #tpu.memory_space<vmem>>, vector<1x24x128xf32>,
    return
  }
  func.func @transform_0(%arg0: i32) -> (i32, i32, i32) {
    %c0_i32 = arith.constant 0 : i32
    %c0_i32_0 = arith.constant 0 : i32
    %c0_i32_1 = arith.constant 0 : i32
    return %arg0, %c0_i32, %c0_i32_0 : i32, i32, i32
  }
  func.func @transform_1(%arg0: i32) -> (i32, i32) {
    %c0_i32 = arith.constant 0 : i32
    %c0_i32_0 = arith.constant 0 : i32
    %c0_i32_1 = arith.constant 0 : i32
    return %c0_i32, %c0_i32_0 : i32, i32
  }
  func.func @transform_2(%arg0: i32) -> (i32, i32) {
    %c0_i32 = arith.constant 0 : i32
    %c0_i32_0 = arith.constant 0 : i32
    %c0_i32_1 = arith.constant 0 : i32
    return %c0_i32, %c0_i32_0 : i32, i32
  }
  func.func @transform_3(%arg0: i32) -> (i32, i32) {
    %c0_i32 = arith.constant 0 : i32
    %c0_i32_0 = arith.constant 0 : i32
    %c0_i32_1 = arith.constant 0 : i32
    return %c0_i32, %c0_i32_0 : i32, i32
  }
  func.func @transform_4(%arg0: i32) -> (i32, i32) {
    %c0_i32 = arith.constant 0 : i32
    %c0_i32_0 = arith.constant 0 : i32
    %c0_i32_1 = arith.constant 0 : i32
    return %c0_i32, %c0_i32_0 : i32, i32
  }
  func.func @transform_5(%arg0: i32) -> (i32, i32) {
    %c0_i32 = arith.constant 0 : i32
    %c0_i32_0 = arith.constant 0 : i32
    %c0_i32_1 = arith.constant 0 : i32
    return %c0_i32, %c0_i32_0 : i32, i32
  }
  func.func @transform_6(%arg0: i32) -> (i32, i32) {
    %c0_i32 = arith.constant 0 : i32
    %c0_i32_0 = arith.constant 0 : i32
    %c0_i32_1 = arith.constant 0 : i32
    return %c0_i32, %c0_i32_0 : i32, i32
  }
  func.func @transform_7(%arg0: i32) -> (i32, i32) {
    %c0_i32 = arith.constant 0 : i32
    %c0_i32_0 = arith.constant 0 : i32
    %c0_i32_1 = arith.constant 0 : i32
    return %c0_i32, %c0_i32_0 : i32, i32
  }
  func.func @transform_8(%arg0: i32) -> (i32, i32) {
    %c0_i32 = arith.constant 0 : i32
    %c0_i32_0 = arith.constant 0 : i32
    %c0_i32_1 = arith.constant 0 : i32
    return %c0_i32, %c0_i32_0 : i32, i32
  }
  func.func @transform_9(%arg0: i32) -> (i32, i32) {
    %c0_i32 = arith.constant 0 : i32
    %c0_i32_0 = arith.constant 0 : i32
    %c0_i32_1 = arith.constant 0 : i32
    return %c0_i32, %c0_i32_0 : i32, i32
  }
  func.func @transform_10(%arg0: i32) -> (i32, i32) {
    %c0_i32 = arith.constant 0 : i32
    %c0_i32_0 = arith.constant 0 : i32
    %c0_i32_1 = arith.constant 0 : i32
    return %c0_i32, %c0_i32_0 : i32, i32
  }
  func.func @transform_11(%arg0: i32) -> (i32, i32) {
    %c0_i32 = arith.constant 0 : i32
    %c0_i32_0 = arith.constant 0 : i32
    %c0_i32_1 = arith.constant 0 : i32
    return %c0_i32, %c0_i32_0 : i32, i32
  }
  func.func @transform_12(%arg0: i32) -> (i32, i32) {
    %c0_i32 = arith.constant 0 : i32
    %c0_i32_0 = arith.constant 0 : i32
    %c0_i32_1 = arith.constant 0 : i32
    return %c0_i32, %c0_i32_0 : i32, i32
  }
  func.func @transform_13(%arg0: i32) -> (i32, i32, i32) {
    %c0_i32 = arith.constant 0 : i32
    %c0_i32_0 = arith.constant 0 : i32
    %c0_i32_1 = arith.constant 0 : i32
    return %arg0, %c0_i32, %c0_i32_0 : i32, i32, i32
  }
}

module attributes {stable_mosaic.version = 11 : i64} {
  func.func @_head_kernel(%arg0: i32, %arg1: memref<2x128xf32, #tpu.memory_space<vmem>>, %arg2: memref<1x128xf32, #tpu.memory_space<vmem>>, %arg3: memref<1x128xf32, #tpu.memory_space<vmem>>, %arg4: memref<128x128xbf16, #tpu.memory_space<vmem>>, %arg5: memref<1x128xf32, #tpu.memory_space<vmem>>, %arg6: memref<2x128xf32, #tpu.memory_space<vmem>>) attributes {dimension_semantics = [#tpu.dimension_semantics<arbitrary>], iteration_bounds = array<i64: 1>, scalar_prefetch = 0 : i64, scratch_operands = 0 : i64, tpu.core_type = #tpu.core_type<tc>, window_params = [{pipeline_mode = #tpu.pipeline_mode<synchronous>, transform_indices = @transform_0, window_bounds = array<i64: 2, 128>}, {pipeline_mode = #tpu.pipeline_mode<synchronous>, transform_indices = @transform_1, window_bounds = array<i64: 1, 128>}, {pipeline_mode = #tpu.pipeline_mode<synchronous>, transform_indices = @transform_2, window_bounds = array<i64: 1, 128>}, {pipeline_mode = #tpu.pipeline_mode<synchronous>, transform_indices = @transform_3, window_bounds = array<i64: 128, 128>}, {pipeline_mode = #tpu.pipeline_mode<synchronous>, transform_indices = @transform_4, window_bounds = array<i64: 1, 128>}, {pipeline_mode = #tpu.pipeline_mode<synchronous>, transform_indices = @transform_5, window_bounds = array<i64: 2, 128>}]} {
    %c0 = arith.constant 0 : index
    %c0_0 = arith.constant 0 : index
    %0 = vector.load %arg1[%c0, %c0_0] : memref<2x128xf32, #tpu.memory_space<vmem>>, vector<2x128xf32>
    %c0_1 = arith.constant 0 : index
    %c0_2 = arith.constant 0 : index
    %1 = vector.load %arg2[%c0_1, %c0_2] : memref<1x128xf32, #tpu.memory_space<vmem>>, vector<1x128xf32>
    %c0_3 = arith.constant 0 : index
    %c0_4 = arith.constant 0 : index
    %2 = vector.load %arg3[%c0_3, %c0_4] : memref<1x128xf32, #tpu.memory_space<vmem>>, vector<1x128xf32>
    %cst = arith.constant dense<0.000000e+00> : vector<2xf32>
    %3 = vector.multi_reduction <add>, %0, %cst [1] : vector<2x128xf32> to vector<2xf32>
    %4 = vector.shape_cast %3 : vector<2xf32> to vector<2x1xf32>
    %cst_5 = arith.constant 1.280000e+02 : f32
    %5 = vector.broadcast %cst_5 : f32 to vector<2x1xf32>
    %6 = arith.divf %4, %5 : vector<2x1xf32>
    %7 = vector.broadcast %6 : vector<2x1xf32> to vector<2x128xf32>
    %8 = arith.subf %0, %7 : vector<2x128xf32>
    %9 = arith.mulf %8, %8 : vector<2x128xf32>
    %cst_6 = arith.constant dense<0.000000e+00> : vector<2xf32>
    %10 = vector.multi_reduction <add>, %9, %cst_6 [1] : vector<2x128xf32> to vector<2xf32>
    %11 = vector.shape_cast %10 : vector<2xf32> to vector<2x1xf32>
    %cst_7 = arith.constant 1.280000e+02 : f32
    %12 = vector.broadcast %cst_7 : f32 to vector<2x1xf32>
    %13 = arith.divf %11, %12 : vector<2x1xf32>
    %cst_8 = arith.constant 9.99999997E-7 : f32
    %14 = vector.broadcast %cst_8 : f32 to vector<2x1xf32>
    %15 = arith.addf %13, %14 : vector<2x1xf32>
    %16 = math.rsqrt %15 : vector<2x1xf32>
    %17 = vector.broadcast %16 : vector<2x1xf32> to vector<2x128xf32>
    %18 = arith.mulf %8, %17 : vector<2x128xf32>
    %19 = vector.broadcast %1 : vector<1x128xf32> to vector<2x128xf32>
    %20 = arith.mulf %18, %19 : vector<2x128xf32>
    %21 = vector.broadcast %2 : vector<1x128xf32> to vector<2x128xf32>
    %22 = arith.addf %20, %21 : vector<2x128xf32>
    %23 = arith.truncf %22 : vector<2x128xf32> to vector<2x128xbf16>
    %c0_9 = arith.constant 0 : index
    %c0_10 = arith.constant 0 : index
    %24 = vector.load %arg4[%c0_9, %c0_10] : memref<128x128xbf16, #tpu.memory_space<vmem>>, vector<128x128xbf16>
    %cst_11 = arith.constant dense<0.000000e+00> : vector<2x128xf32>
    %25 = tpu.matmul %23, %24, %cst_11 {dimension_numbers = #tpu.dot_dimension_numbers<[1], [0], [0], [1], [0, 0, 1, 1], [], []>} : vector<2x128xbf16>, vector<128x128xbf16>, vector<2x128xf32> -> vector<2x128xf32>
    %c0_12 = arith.constant 0 : index
    %c0_13 = arith.constant 0 : index
    %26 = vector.load %arg5[%c0_12, %c0_13] : memref<1x128xf32, #tpu.memory_space<vmem>>, vector<1x128xf32>
    %27 = vector.broadcast %26 : vector<1x128xf32> to vector<2x128xf32>
    %28 = arith.addf %25, %27 : vector<2x128xf32>
    %c0_14 = arith.constant 0 : index
    %c0_15 = arith.constant 0 : index
    %29 = vector.load %arg6[%c0_14, %c0_15] : memref<2x128xf32, #tpu.memory_space<vmem>>, vector<2x128xf32>
    tpu.vector_store %arg6[%c0_14, %c0_15], %28 {strides = array<i32>} : memref<2x128xf32, #tpu.memory_space<vmem>>, vector<2x128xf32>,
    return
  }
  func.func @transform_0(%arg0: i32) -> (i32, i32) {
    %c0_i32 = arith.constant 0 : i32
    %c0_i32_0 = arith.constant 0 : i32
    %c0_i32_1 = arith.constant 0 : i32
    return %c0_i32, %c0_i32_0 : i32, i32
  }
  func.func @transform_1(%arg0: i32) -> (i32, i32) {
    %c0_i32 = arith.constant 0 : i32
    %c0_i32_0 = arith.constant 0 : i32
    %c0_i32_1 = arith.constant 0 : i32
    return %c0_i32, %c0_i32_0 : i32, i32
  }
  func.func @transform_2(%arg0: i32) -> (i32, i32) {
    %c0_i32 = arith.constant 0 : i32
    %c0_i32_0 = arith.constant 0 : i32
    %c0_i32_1 = arith.constant 0 : i32
    return %c0_i32, %c0_i32_0 : i32, i32
  }
  func.func @transform_3(%arg0: i32) -> (i32, i32) {
    %c0_i32 = arith.constant 0 : i32
    %c0_i32_0 = arith.constant 0 : i32
    %c0_i32_1 = arith.constant 0 : i32
    return %c0_i32, %c0_i32_0 : i32, i32
  }
  func.func @transform_4(%arg0: i32) -> (i32, i32) {
    %c0_i32 = arith.constant 0 : i32
    %c0_i32_0 = arith.constant 0 : i32
    %c0_i32_1 = arith.constant 0 : i32
    return %c0_i32, %c0_i32_0 : i32, i32
  }
  func.func @transform_5(%arg0: i32) -> (i32, i32) {
    %c0_i32 = arith.constant 0 : i32
    %c0_i32_0 = arith.constant 0 : i32
    %c0_i32_1 = arith.constant 0 : i32
    return %c0_i32, %c0_i32_0 : i32, i32
  }
}

</mosaic_0001>

<bundles_post_ra>
// kernel: vit_forward.7
= control target key start
LH: loop header
LB: loop body
LE: loop exit
PB: predicated region body
PF: predicated region fallthrough
CT: control target
= control target key end

     0   :  { %vm25_vm0 = vcmask 1041408   ;;  %s330_s0 = inlined_call_operand.vmem [shape: f32[2,128], index: 0, kind: input, shape index: {}]   ;;  %s331_s1 = inlined_call_operand.vmem [shape: f32[1,128], index: 1, kind: input, shape index: {}]   ;;  %s332_s2 = inlined_call_operand.vmem [shape: f32[1,128], index: 2, kind: input, shape index: {}]   ;;  %s333_s3 = inlined_call_operand.vmem [shape: bf16[128,128], index: 3, kind: input, shape index: {}]   ;;  %s334_s4 = inlined_call_operand.vmem [shape: f32[1,128], index: 4, kind: input, shape index: {}]   ;;  %s335_s5 = inlined_call_operand.hbm [shape: f32[2,128], index: 5, kind: output, shape index: {}]  }
   0x1   :  { %v22_v0 = vld [vmem:[%s330_s0] sm:$0x3] }
   0x2   :  { %v26_v1 = vsel %vm25_vm0, %v22_v0, 0.0 }
   0x3   :  { %27 = vadd.xlane.f32.xlu0 %v26_v1 }
   0x4   :  { %10 = vsyncpa [#allocation3], 0  ;;  %v224_v2 = vld [vmem:[%s333_s3 + $0x38] sm:$0xff]   ;;  %v256_v3 = vmov 0.0   ;;  %v225_v4 = vld [vmem:[%s333_s3 + $0x30] sm:$0xff]   ;;  %vm257_vm1 = vmmov 0  }
   0x5   :  { %201 = vmatprep.subr.bf16.mxu0 %v256_v3  ;;  %v226_v10 = vld [vmem:[%s333_s3 + $0x28] sm:$0xff]   ;;  %v227_v11 = vld [vmem:[%s333_s3 + $0x20] sm:$0xff]   ;;  %217 = vmatprep.mubr.msk.bf16.mxu0 %vm257_vm1, %v256_v3  ;;  %v228_v12 = vld [vmem:[%s333_s3 + $0x18] sm:$0xff]   ;;  %s258_s15 = smov [#allocation2]  }
   0x6   :  { %202 = vmatpush3.bf16.msra.mxu0 %v224_v2  ;;  %v229_v13 = vld [vmem:[%s333_s3 + $0x10] sm:$0xff]   ;;  %v230_v14 = vld [vmem:[%s333_s3 + $0x8] sm:$0xff]   ;;  %v231_v15 = vld [vmem:[%s333_s3] sm:$0xff]   ;;  %s173_s16 = sshll.u32 %s258_s15, 4  ;;  %s174_s16 = int_to_ptr.vmem [resolvable:$true] %s173_s16 }
   0x7   :  { %203 = vmatprep.subr.bf16.mxu0 %v256_v3  ;;  %v181_v20 = vld [vmem:[%s331_s1] ss:$0 sm:$0xff]  ;;  %s234_s1 = scalar_lea.vmem %s174_s16, 32  ;;  %p239_p1 = scmp.lt.s32.totalorder %s174_s16, %s174_s16 }
   0x8   :  { %v182_v22 = vld [vmem:[%s332_s2] ss:$0 sm:$0xff]  ;;  %p235_p0 = scmp.ne.s32.totalorder %s174_s16, %s234_s1  ;;  %p240_p2 = scmp.lt.s32.totalorder %s234_s1, %s234_s1 }
   0x9   :  { %v183_v26 = vld [vmem:[%s334_s4] ss:$0 sm:$0xff] }
   0xa   :  { %204 = vmatpush3.bf16.msra.mxu0 %v225_v4  ;;  %p241_p3 = por %p240_p2, %p239_p1 }
   0xb   :  { %205 = vmatprep.subr.bf16.mxu0 %v256_v3 }
   0xc   :  { %p242_p4 = pnand %p241_p3, %p235_p0 }
   0xe   :  { %206 = vmatpush3.bf16.msra.mxu0 %v226_v10 }
   0xf   :  { %207 = vmatprep.subr.bf16.mxu0 %v256_v3 }
  0x12   :  { %208 = vmatpush3.bf16.msra.mxu0 %v227_v11 }
  0x13   :  { %209 = vmatprep.subr.bf16.mxu0 %v256_v3 }
  0x16   :  { %210 = vmatpush3.bf16.msra.mxu0 %v228_v12 }
  0x17   :  { %211 = vmatprep.subr.bf16.mxu0 %v256_v3 }
  0x1a   :  { %212 = vmatpush3.bf16.msra.mxu0 %v229_v13 }
  0x1b   :  { %213 = vmatprep.subr.bf16.mxu0 %v256_v3 }
  0x1e   :  { %214 = vmatpush3.bf16.msra.mxu0 %v230_v14 }
  0x1f   :  { %215 = vmatprep.subr.bf16.mxu0 %v256_v3 }
  0x22   :  { %216 = vmatpush3.bf16.msra.mxu0 %v231_v15 }
  0x8c   :  { %v28_v5 = vpop.xlane.xlu0 %27 }
  0x8d   :  { %v30_v6 = vmul.f32 0.0078125, %v28_v5 }
  0x8f   :  { %v31_v7 = vsub.f32 %v22_v0, %v30_v6 }
  0x91   :  { %v32_v8 = vmul.f32 %v31_v7, %v31_v7 }
  0x93   :  { %v33_v9 = vsel %vm25_vm0, %v32_v8, 0.0 }
  0x94   :  { %34 = vadd.xlane.f32.xlu0 %v33_v9 }
 0x11d   :  { %v35_v16 = vpop.xlane.xlu0 %34 }
 0x11e   :  { %v36_v17 = vmul.f32 0.0078125, %v35_v16 }
 0x120   :  { %v37_v18 = vadd.f32 1e-06, %v36_v17 }
 0x122   :  { %232 = vrsqrt.f32 %v37_v18 }
 0x12f   :  { %v233_v19 = vpop.eup %232 }
 0x130   :  { %v39_v21 = vmul.f32 %v233_v19, %v31_v7 }
 0x132   :  { %v46_v23 = vmul.f32 %v181_v20, %v39_v21 }
 0x134   :  { %v53_v24 = vadd.f32 %v182_v22, %v46_v23 }
 0x136   :  { %v54_v25 = vpack.c.bf16 %v53_v24, %v53_v24 }
 0x138   :  { %218 = vmatmul.mubr.bf16.vlgmr.msra.gmra.mxu0 %v54_v25 }
 0x1f8   :  { %v160_v27 = vpop.f32.mrf.mxu0 }
 0x1f9   :  { %v161_v28 = vadd.f32 %v183_v26, %v160_v27 }
 0x1fa   :  { %v219_v29 = vpop.f32.mrf.mxu0 }
 0x1fb   :  { %166 = vst [vmem:[#allocation2] sm:$0x3] %v161_v28 }
 0x1fc   :  { %v163_v30 = vpop.f32.mrf.mxu0 }
 0x1fd   :  { %245 = shalt.err (!%p242_p4)
}
 0x1fe   :  { %176 = dma.vmem_to_hbm [thread:$0]  %s174_s16, 32, %s335_s5, [#allocation3]   ;;  %v220_v31 = vpop.f32.mrf.mxu0 }
 0x1ff   :  { %254 = dma.done.wait [#allocation3], 32  }
 0x200   :  { %255 = vsyncadd [#allocation3], 4294967264 }
 0x201   :  { %180 = vsyncpa [#allocation3], 1 }

// kernel: vit_forward.4
= control target key start
LH: loop header
LB: loop body
LE: loop exit
PB: predicated region body
PF: predicated region fallthrough
CT: control target
= control target key end

     0   :  { %s1087_s18 = smov 0   ;;  %s1279_s0 = inlined_call_operand.vmem [shape: bf16[2,16,768], index: 0, kind: input, shape index: {}]   ;;  %s1280_s1 = inlined_call_operand.vmem [shape: bf16[768,128], index: 1, kind: input, shape index: {}]   ;;  %s1281_s2 = inlined_call_operand.vmem [shape: f32[1,128], index: 2, kind: input, shape index: {}]   ;;  %s1282_s3 = inlined_call_operand.vmem [shape: f32[1,128], index: 3, kind: input, shape index: {}]   ;;  %s1283_s4 = inlined_call_operand.vmem [shape: f32[24,128], index: 4, kind: input, shape index: {}]   ;;  %s1284_s5 = inlined_call_operand.vmem [shape: f32[2,24,128], index: 5, kind: output, shape index: {}]  }
   0x1 LB: > { %s852_s19 = sadd.s32 4294967295, %s1055_s18   ;;  %p856_p0 = scmp.ge.s32.totalorder %s1055_s18, 1  ;;  %s1055_s18 = sphi %s1087_s18, %s15_s18  }
   0x2   : > { %p187_p1 = scmp.lt.s32.totalorder %s1055_s18, 3 }
   0x4   : > { %p188_p2 = pnand %p856_p0, %p187_p1 }
   0x5   : > { %p215_p3 = scmp.lt.s32.totalorder (!%p188_p2), %s852_s19, 1 }
   0x6   : > { %191 = sbr.rel (%p188_p2) target bundleno = 285 (0x11d), region = 40 }
   0xb   : > { %v992_v0 = vld [vmem:[%s1280_s1 + $0x78] sm:$0xff]   ;;  %v996_v4 = vld [vmem:[%s1280_s1 + $0x70] sm:$0xff]   ;;  %v1000_v8 = vld [vmem:[%s1280_s1 + $0x68] sm:$0xff]   ;;  %s1286_s19 = smov (!%p215_p3, %s852_s19), 1  ;;  %vm779_vm0 = vcmask 1040384  }
   0xc   : > { %v993_v1 = vld [vmem:[%s1280_s1 + $0x38] sm:$0xff]   ;;  %916 = vmatprep.subr.bf16.mxu0 %v992_v0  ;;  %v997_v5 = vld [vmem:[%s1280_s1 + $0x30] sm:$0xff]   ;;  %v1001_v9 = vld [vmem:[%s1280_s1 + $0x28] sm:$0xff]   ;;  %s982_s24 = smul.u32 48, %s1286_s19 }
   0xd   : > { %v994_v2 = vld [vmem:[%s1280_s1 + $0xf8] sm:$0xff]   ;;  %917 = vmatpush3.bf16.msra.mxu0 %v993_v1  ;;  %v998_v6 = vld [vmem:[%s1280_s1 + $0xf0] sm:$0xff]   ;;  %v1002_v10 = vld [vmem:[%s1280_s1 + $0xe8] sm:$0xff]  }
   0xe   : > { %v995_v3 = vld [vmem:[%s1280_s1 + $0xb8] sm:$0xff]   ;;  %938 = vmatprep.subr.bf16.mxu1 %v994_v2  ;;  %918 = vmatprep.subr.bf16.mxu0 %v996_v4  ;;  %v999_v7 = vld [vmem:[%s1280_s1 + $0xb0] sm:$0xff]   ;;  %v1003_v11 = vld [vmem:[%s1280_s1 + $0xa8] sm:$0xff]   ;;  %s1192_s10 = scalar_lea.vmem %s1279_s0, %s982_s24 }
   0xf   : > { %939 = vmatpush3.bf16.msra.mxu1 %v995_v3  ;;  %v1004_v12 = vld [vmem:[%s1280_s1 + $0x60] sm:$0xff]   ;;  %v1008_v16 = vld [vmem:[%s1280_s1 + $0x58] sm:$0xff]   ;;  %v1012_v20 = vld [vmem:[%s1280_s1 + $0x50] sm:$0xff]  }
  0x10   : > { %940 = vmatprep.subr.bf16.mxu1 %v998_v6  ;;  %v1005_v13 = vld [vmem:[%s1280_s1 + $0x20] sm:$0xff]   ;;  %v1009_v17 = vld [vmem:[%s1280_s1 + $0x18] sm:$0xff]   ;;  %v1013_v21 = vld [vmem:[%s1280_s1 + $0x10] sm:$0xff]  }
  0x11   : > { %919 = vmatpush3.bf16.msra.mxu0 %v997_v5  ;;  %v1006_v14 = vld [vmem:[%s1280_s1 + $0xe0] sm:$0xff]   ;;  %v1010_v18 = vld [vmem:[%s1280_s1 + $0xd8] sm:$0xff]   ;;  %v1014_v22 = vld [vmem:[%s1280_s1 + $0xd0] sm:$0xff]  }
  0x12   : > { %920 = vmatprep.subr.bf16.mxu0 %v1000_v8  ;;  %v1007_v15 = vld [vmem:[%s1280_s1 + $0xa0] sm:$0xff]   ;;  %v1011_v19 = vld [vmem:[%s1280_s1 + $0x98] sm:$0xff]   ;;  %v1015_v23 = vld [vmem:[%s1280_s1 + $0x90] sm:$0xff]  }
  0x13   : > { %941 = vmatpush3.bf16.msra.mxu1 %v999_v7  ;;  %v1016_v24 = vld [vmem:[%s1280_s1 + $0x48] sm:$0xff]   ;;  %v1020_v28 = vld [vmem:[%s1280_s1 + $0x40] sm:$0xff]   ;;  %v1027_v34 = vld [vmem:[%s1280_s1 + $0x178] sm:$0xff]  }
  0x14   : > { %942 = vmatprep.subr.bf16.mxu1 %v1002_v10  ;;  %v1017_v25 = vld [vmem:[%s1280_s1 + $0x8] sm:$0xff]   ;;  %v1021_v29 = vld [vmem:[%s1280_s1] sm:$0xff]   ;;  %v1031_v37 = vld [vmem:[%s1280_s1 + $0x138] sm:$0xff]  }
  0x15   : > { %921 = vmatpush3.bf16.msra.mxu0 %v1001_v9  ;;  %v1018_v26 = vld [vmem:[%s1280_s1 + $0xc8] sm:$0xff]   ;;  %v1022_v30 = vld [vmem:[%s1280_s1 + $0xc0] sm:$0xff]   ;;  %v1032_v38 = vld [vmem:[%s1280_s1 + $0x170] sm:$0xff]  }
  0x16   : > { %922 = vmatprep.subr.bf16.mxu0 %v1004_v12  ;;  %v1019_v27 = vld [vmem:[%s1280_s1 + $0x88] sm:$0xff]   ;;  %v1023_v31 = vld [vmem:[%s1192_s10] ss:$24 sps:$4 sm:$0xff]   ;;  %v1025_v32 = vld [vmem:[%s1192_s10 + $0x4] ss:$24 sps:$4 sm:$0xff]  }
  0x17   : > { %943 = vmatpush3.bf16.msra.mxu1 %v1003_v11  ;;  %v1026_v33 = vld [vmem:[%s1280_s1 + $0x80] sm:$0xff]   ;;  %685 = vmatprep.mubr.bf16.mxu0 %v1025_v32  ;;  %v1033_v39 = vld [vmem:[%s1280_s1 + $0x130] sm:$0xff]   ;;  %v1034_v40 = vld [vmem:[%s1280_s1 + $0x168] sm:$0xff]  }
  0x18   : > { %944 = vmatprep.subr.bf16.mxu1 %v1006_v14  ;;  %v1028_v35 = vld [vmem:[%s1192_s10 + $0x8] ss:$24 sps:$4 sm:$0xff]   ;;  %v1030_v36 = vld [vmem:[%s1192_s10 + $0xc] ss:$24 sps:$4 sm:$0xff]   ;;  %v1038_v44 = vld [vmem:[%s1280_s1 + $0x158] sm:$0xff]  }
  0x19   : > { %923 = vmatpush3.bf16.msra.mxu0 %v1005_v13  ;;  %726 = vmatprep.mubr.bf16.mxu1 %v1030_v36  ;;  %v1035_v41 = vld [vmem:[%s1280_s1 + $0x128] sm:$0xff]   ;;  %v1036_v42 = vld [vmem:[%s1280_s1 + $0x160] sm:$0xff]   ;;  %v1039_v45 = vld [vmem:[%s1280_s1 + $0x118] sm:$0xff]  }
  0x1a   : > { %924 = vmatprep.subr.bf16.mxu0 %v1008_v16  ;;  %v1037_v43 = vld [vmem:[%s1280_s1 + $0x120] sm:$0xff]   ;;  %v1040_v46 = vld [vmem:[%s1280_s1 + $0x150] sm:$0xff]   ;;  %v1042_v49 = vld [vmem:[%s1280_s1 + $0x148] sm:$0xff]  }
  0x1b   : > { %945 = vmatpush3.bf16.msra.mxu1 %v1007_v15  ;;  %v1048_v47 = vld [vmem:[%s1192_s10 + $0x14] ss:$24 sps:$4 sm:$0xff]   ;;  %v1044_v51 = vld [vmem:[%s1280_s1 + $0x140] sm:$0xff]   ;;  %v1046_v53 = vld [vmem:[%s1192_s10 + $0x10] ss:$24 sps:$4 sm:$0xff]   ;;  %s983_s10 = smul.u32 24, %s1286_s19 }
  0x1c   : > { %946 = vmatprep.subr.bf16.mxu1 %v1010_v18  ;;  %v1041_v48 = vld [vmem:[%s1280_s1 + $0x110] sm:$0xff]   ;;  %v1043_v50 = vld [vmem:[%s1280_s1 + $0x108] sm:$0xff]   ;;  %v1045_v52 = vld [vmem:[%s1280_s1 + $0x100] sm:$0xff]  }
  0x1d   : > { %925 = vmatpush3.bf16.msra.mxu0 %v1009_v17  ;;  %v859_v60 = vld [vmem:[%s1281_s2] ss:$0 sm:$0xff]  ;;  %s224_s13 = scalar_lea.vmem %s1284_s5, %s983_s10 }
  0x1e   : > { %926 = vmatprep.subr.bf16.mxu0 %v1012_v20  ;;  %v776_v12 = vld [vmem:[%s1282_s3] sm:$0x1] }
  0x1f   : > { %947 = vmatpush3.bf16.msra.mxu1 %v1011_v19  ;;  %v788_v16 = vld [vmem:[%s1283_s4] sm:$0xff] }
  0x20   : > { %948 = vmatprep.subr.bf16.mxu1 %v1014_v22  ;;  %v790_v22 = vld [vmem:[%s1283_s4 + $0x10] sm:$0xff] }
  0x21   : > { %927 = vmatpush3.bf16.msra.mxu0 %v1013_v21  ;;  %v789_v21 = vld [vmem:[%s1283_s4 + $0x8] sm:$0xff] }
  0x22   : > { %928 = vmatprep.subr.bf16.mxu0 %v1016_v24 }
  0x23   : > { %949 = vmatpush3.bf16.msra.mxu1 %v1015_v23 }
  0x24   : > { %950 = vmatprep.subr.bf16.mxu1 %v1018_v26 }
  0x25   : > { %929 = vmatpush3.bf16.msra.mxu0 %v1017_v25 }
  0x26   : > { %930 = vmatprep.subr.bf16.mxu0 %v1020_v28 }
  0x27   : > { %951 = vmatpush3.bf16.msra.mxu1 %v1019_v27 }
  0x28   : > { %952 = vmatprep.subr.bf16.mxu1 %v1022_v30 }
  0x29   : > { %931 = vmatpush3.bf16.msra.mxu0 %v1021_v29 }
  0x2a   : > { %960 = vmatprep.subr.bf16.mxu0 %v1027_v34 }
  0x2b   : > { %953 = vmatpush3.bf16.msra.mxu1 %v1026_v33 }
  0x2c   : > { %686 = vmatmul.mubr.bf16.vlgmr.msra.gmra.mxu0 %v1023_v31 }
  0x2d   : > { %961 = vmatpush3.bf16.msra.mxu0 %v1031_v37  ;;  %767 = vmatprep.mubr.bf16.mxu0 %v1048_v47 }
  0x2e   : > { %727 = vmatmul.mubr.bf16.vlgmr.msra.gmra.mxu1 %v1028_v35  ;;  %962 = vmatprep.subr.bf16.mxu0 %v1032_v38 }
  0x31   : > { %963 = vmatpush3.bf16.msra.mxu0 %v1033_v39 }
  0x32   : > { %964 = vmatprep.subr.bf16.mxu0 %v1034_v40 }
  0x35   : > { %965 = vmatpush3.bf16.msra.mxu0 %v1035_v41 }
  0x36   : > { %966 = vmatprep.subr.bf16.mxu0 %v1036_v42 }
  0x39   : > { %967 = vmatpush3.bf16.msra.mxu0 %v1037_v43 }
  0x3a   : > { %968 = vmatprep.subr.bf16.mxu0 %v1038_v44 }
  0x3d   : > { %969 = vmatpush3.bf16.msra.mxu0 %v1039_v45 }
  0x3e   : > { %970 = vmatprep.subr.bf16.mxu0 %v1040_v46 }
  0x41   : > { %971 = vmatpush3.bf16.msra.mxu0 %v1041_v48 }
  0x42   : > { %972 = vmatprep.subr.bf16.mxu0 %v1042_v49 }
  0x45   : > { %973 = vmatpush3.bf16.msra.mxu0 %v1043_v50 }
  0x46   : > { %974 = vmatprep.subr.bf16.mxu0 %v1044_v51 }
  0x49   : > { %975 = vmatpush3.bf16.msra.mxu0 %v1045_v52 }
  0x4c   : > { %768 = vmatmul.mubr.bf16.vlgmr.msra.gmra.mxu0 %v1046_v53 }
  0xec   : > { %v932_v54 = vpop.f32.mrf.mxu0 }
  0xee   : > { %v933_v55 = vpop.f32.mrf.mxu0  ;;  %v954_v56 = vpop.f32.mrf.mxu1 }
  0xef   : > { %v934_v59 = vadd.f32 %v933_v55, %v932_v54 }
  0xf0   : > { %v935_v57 = vpop.f32.mrf.mxu0  ;;  %v955_v58 = vpop.f32.mrf.mxu1 }
  0xf1   : > { %v688_v63 = vadd.f32 %v934_v59, %v859_v60  ;;  %v956_v0 = vadd.f32 %v955_v58, %v954_v56 }
  0xf2   : > { %v936_v61 = vpop.f32.mrf.mxu0  ;;  %v957_v62 = vpop.f32.mrf.mxu1 }
  0xf3   : > { %v937_v1 = vadd.f32 %v936_v61, %v935_v57  ;;  %v729_v5 = vadd.f32 %v956_v0, %v688_v63 }
  0xf4   : > { %v958_v2 = vpop.f32.mrf.mxu1 }
  0xf5   : > { %v691_v6 = vadd.f32 %v937_v1, %v859_v60  ;;  %v959_v7 = vadd.f32 %v958_v2, %v957_v62 }
  0xf7   : > { %v732_v13 = vadd.f32 %v959_v7, %v691_v6 }
 0x10c   : > { %v976_v3 = vpop.f32.mrf.mxu0 }
 0x10e   : > { %v977_v4 = vpop.f32.mrf.mxu0 }
 0x10f   : > { %v978_v8 = vadd.f32 %v977_v4, %v976_v3 }
 0x110   : > { %v979_v9 = vpop.f32.mrf.mxu0 }
 0x111   : > { %v770_v10 = vadd.f32 %v978_v8, %v729_v5 }
 0x112   : > { %v980_v11 = vpop.f32.mrf.mxu0 }
 0x113   : > { %v780_v14 = vrot.slane %v770_v10, 7  ;;  %v981_v15 = vadd.f32 %v980_v11, %v979_v9 }
 0x115   : > { %v773_v17 = vadd.f32 %v981_v15, %v732_v13  ;;  %v786_v18 = vsel %vm779_vm0, %v776_v12, %v780_v14 }
 0x116   : > { %v791_v19 = vadd.f32 %v788_v16, %v786_v18 }
 0x117   : > { %v781_v20 = vrot.slane %v773_v17, 7 }
 0x118   : > { %794 = vst [vmem:[%s224_s13] sm:$0xff] %v791_v19 }
 0x119   : > { %v782_v23 = vsel %vm779_vm0, %v780_v14, %v781_v20  ;;  %v787_v24 = vsel %vm779_vm0, %v781_v20, 0.0 }
 0x11a   : > { %v792_v25 = vadd.f32 %v789_v21, %v782_v23  ;;  %v793_v26 = vadd.f32 %v790_v22, %v787_v24 }
 0x11c   : > { %795 = vst [vmem:[%s224_s13 + $0x8] sm:$0xff] %v792_v25  ;;  %796 = vst [vmem:[%s224_s13 + $0x10] sm:$0xff] %v793_v26 }
 0x11d PF: > { %s15_s18 = sadd.s32 1, %s1055_s18  }
 0x11e   : > { %p12_p4 = scmp.ge.s32.totalorder %s15_s18, 4  }
 0x120   :  { %14 = sbr.rel (!%p12_p4) target bundleno = 1 (0x1), region = 70 }

// kernel: vit_forward.5
= control target key start
LH: loop header
LB: loop body
LE: loop exit
PB: predicated region body
PF: predicated region fallthrough
CT: control target
= control target key end

     0   :  { %s3200_s25 = smov 0   ;;  %s3881_s0 = inlined_call_operand.vmem [shape: f32[2,24,128], index: 0, kind: input, shape index: {}]   ;;  %s3882_s1 = inlined_call_operand.vmem [shape: f32[1,128], index: 1, kind: input, shape index: {}]   ;;  %s3883_s2 = inlined_call_operand.vmem [shape: f32[1,128], index: 2, kind: input, shape index: {}]   ;;  %s3884_s3 = inlined_call_operand.vmem [shape: bf16[128,384], index: 3, kind: input, shape index: {}]   ;;  %s3885_s4 = inlined_call_operand.vmem [shape: f32[1,384], index: 4, kind: input, shape index: {}]   ;;  %s3886_s5 = inlined_call_operand.vmem [shape: bf16[128,128], index: 5, kind: input, shape index: {}]   ;;  %s3887_s6 = inlined_call_operand.vmem [shape: f32[1,128], index: 6, kind: input, shape index: {}]   ;;  %s3888_s7 = inlined_call_operand.vmem [shape: f32[1,128], index: 7, kind: input, shape index: {}]   ;;  %s3889_s8 = inlined_call_operand.vmem [shape: f32[1,128], index: 8, kind: input, shape index: {}]   ;;  %s3890_s9 = inlined_call_operand.vmem [shape: bf16[128,512], index: 9, kind: input, shape index: {}]   ;;  %s3891_s10 = inlined_call_operand.vmem [shape: f32[1,512], index: 10, kind: input, shape index: {}]   ;;  %s3892_s11 = inlined_call_operand.vmem [shape: bf16[512,128], index: 11, kind: input, shape index: {}]   ;;  %s3893_s12 = inlined_call_operand.vmem [shape: f32[1,128], index: 12, kind: input, shape index: {}]   ;;  %s3894_s13 = inlined_call_operand.vmem [shape: f32[2,24,128], index: 13, kind: output, shape index: {}]  }
   0x1 LB: > { %s2530_s26 = sadd.s32 4294967295, %s3123_s25   ;;  %p2534_p0 = scmp.ge.s32.totalorder %s3123_s25, 1  ;;  %s3123_s25 = sphi %s3200_s25, %s23_s25  }
   0x2   : > { %p387_p1 = scmp.lt.s32.totalorder %s3123_s25, 3 }
   0x4   : > { %p388_p2 = pnand %p2534_p0, %p387_p1 }
   0x5   : > { %p431_p3 = scmp.lt.s32.totalorder (!%p388_p2), %s2530_s26, 1  ;;  %s3127_s16 = smov (!%p388_p2), 96  }
   0x6   : > { %391 = sbr.rel (%p388_p2) target bundleno = 3432 (0xd68), region = 72  ;;  %s3128_s17 = smov (!%p388_p2), 64  }
   0x7   : > { %s3129_s18 = smov (!%p388_p2), 32  }
   0xb   : > { %s3896_s26 = smov (!%p431_p3, %s2530_s26), 1  ;;  %v2910_v3 = vld [vmem:[%s3884_s3 + $0xac] ss:$12 sps:$4 sm:$0xff]   ;;  %v2912_v4 = vld [vmem:[%s3884_s3 + $0xa8] ss:$12 sps:$4 sm:$0xff]   ;;  %v3125_v32 = vmov 0  }
   0xc   : > { %s2881_s27 = smul.u32 24, %s3896_s26  ;;  %v2913_v5 = vld [vmem:[%s3884_s3 + $0xb0] ss:$12 sps:$4 sm:$0xff]   ;;  %678 = vmatprep.subr.bf16.mxu0 %v2910_v3  ;;  %v2914_v18 = vld [vmem:[%s3884_s3 + $0x94] ss:$12 sps:$4 sm:$0xff]   ;;  %710 = vmatprep.mubr.bf16.mxu0 %v3125_v32  ;;  %vm893_vm0 = vcmask 1043456  }
   0xd   : > { %2765 = vmatprep.subr.bf16.mxu1 %v2913_v5  ;;  %679 = vmatpush1.bf16.msra.mxu0 %v2912_v4  ;;  %v2916_v19 = vld [vmem:[%s3884_s3 + $0x90] ss:$12 sps:$4 sm:$0xff]   ;;  %v2917_v20 = vld [vmem:[%s3884_s3 + $0x98] ss:$12 sps:$4 sm:$0xff]   ;;  %v2921_v23 = vld [vmem:[%s3884_s3 + $0x80] ss:$12 sps:$4 sm:$0xff]  }
   0xe   : > { %s3216_s30 = scalar_lea.vmem %s3881_s0, %s2881_s27  ;;  %2766 = vmatpush3.bf16.msra.mxu1 %v2913_v5  ;;  %680 = vmatprep.subr.bf16.mxu0 %v2914_v18  ;;  %v2918_v21 = vld [vmem:[%s3884_s3 + $0x7c] ss:$12 sps:$4 sm:$0xff]   ;;  %v2920_v22 = vld [vmem:[%s3884_s3 + $0x78] ss:$12 sps:$4 sm:$0xff]   ;;  %v2924_v25 = vld [vmem:[%s3884_s3 + $0x60] ss:$12 sps:$4 sm:$0xff]  }
   0xf   : > { %v442_v0 = vld [vmem:[%s3216_s30] sm:$0xff]  ;;  %v444_v1 = vld [vmem:[%s3216_s30 + $0x10] sm:$0xff]  ;;  %v443_v2 = vld [vmem:[%s3216_s30 + $0x8] sm:$0xff]  ;;  %2767 = vmatprep.subr.bf16.mxu1 %v2917_v20  ;;  %vm790_vm1 = vcmask 261120   ;;  %vm851_vm3 = vcmask 195584   ;;  %vm1485_vm4 = vcmask 523264  }
  0x10   : > { %447 = vadd.xlane.f32.xlu0 %v442_v0  ;;  %451 = vadd.xlane.f32.xlu1 %v444_v1  ;;  %v2922_v24 = vld [vmem:[%s3884_s3 + $0x64] ss:$12 sps:$4 sm:$0xff]   ;;  %v2925_v26 = vld [vmem:[%s3884_s3 + $0x68] ss:$12 sps:$4 sm:$0xff]   ;;  %v2926_v27 = vld [vmem:[%s3884_s3 + $0x4c] ss:$12 sps:$4 sm:$0xff]  }
  0x11   : > { %681 = vmatpush1.bf16.msra.mxu0 %v2916_v19  ;;  %v2929_v28 = vld [vmem:[%s3884_s3 + $0x50] ss:$12 sps:$4 sm:$0xff]   ;;  %v2928_v29 = vld [vmem:[%s3884_s3 + $0x48] ss:$12 sps:$4 sm:$0xff]   ;;  %v2933_v31 = vld [vmem:[%s3884_s3 + $0x38] ss:$12 sps:$4 sm:$0xff]  }
  0x12   : > { %2768 = vmatpush3.bf16.msra.mxu1 %v2917_v20  ;;  %682 = vmatprep.subr.bf16.mxu0 %v2918_v21  ;;  %v2930_v30 = vld [vmem:[%s3884_s3 + $0x34] ss:$12 sps:$4 sm:$0xff]   ;;  %v2932_v33 = vld [vmem:[%s3884_s3 + $0x30] ss:$12 sps:$4 sm:$0xff]   ;;  %v2936_v36 = vld [vmem:[%s3884_s3 + $0x18] ss:$12 sps:$4 sm:$0xff]  }
  0x13   : > { %2769 = vmatprep.subr.bf16.mxu1 %v2921_v23  ;;  %v2934_v34 = vld [vmem:[%s3884_s3 + $0x1c] ss:$12 sps:$4 sm:$0xff]   ;;  %v2937_v35 = vld [vmem:[%s3884_s3 + $0x20] ss:$12 sps:$4 sm:$0xff]   ;;  %v2938_v37 = vld [vmem:[%s3884_s3 + $0x4] ss:$12 sps:$4 sm:$0xff]  }
  0x14   : > { %449 = vadd.xlane.f32.xlu0 %v443_v2  ;;  %v2941_v38 = vld [vmem:[%s3884_s3 + $0x8] ss:$12 sps:$4 sm:$0xff]   ;;  %v2940_v39 = vld [vmem:[%s3884_s3] ss:$12 sps:$4 sm:$0xff]   ;;  %vm1489_vm5 = vcmask 785408  }
  0x15   : > { %683 = vmatpush1.bf16.msra.mxu0 %v2920_v22  ;;  %v2537_v51 = vld [vmem:[%s3882_s1] ss:$0 sm:$0xff] }
  0x16   : > { %2770 = vmatpush3.bf16.msra.mxu1 %v2921_v23  ;;  %684 = vmatprep.subr.bf16.mxu0 %v2922_v24  ;;  %v2538_v57 = vld [vmem:[%s3883_s2] ss:$0 sm:$0xff] }
  0x17   : > { %2771 = vmatprep.subr.bf16.mxu1 %v2925_v26  ;;  %v533_v4 = vld [vmem:[%s3885_s4] sm:$0x7] }
  0x19   : > { %685 = vmatpush1.bf16.msra.mxu0 %v2924_v25 }
  0x1a   : > { %2772 = vmatpush3.bf16.msra.mxu1 %v2925_v26  ;;  %686 = vmatprep.subr.bf16.mxu0 %v2926_v27 }
  0x1b   : > { %2773 = vmatprep.subr.bf16.mxu1 %v2929_v28 }
  0x1d   : > { %687 = vmatpush1.bf16.msra.mxu0 %v2928_v29 }
  0x1e   : > { %2774 = vmatpush3.bf16.msra.mxu1 %v2929_v28  ;;  %688 = vmatprep.subr.bf16.mxu0 %v2930_v30 }
  0x1f   : > { %2775 = vmatprep.subr.bf16.mxu1 %v2933_v31 }
  0x21   : > { %689 = vmatpush1.bf16.msra.mxu0 %v2932_v33 }
  0x22   : > { %2776 = vmatpush3.bf16.msra.mxu1 %v2933_v31  ;;  %690 = vmatprep.subr.bf16.mxu0 %v2934_v34 }
  0x23   : > { %2777 = vmatprep.subr.bf16.mxu1 %v2937_v35 }
  0x25   : > { %691 = vmatpush1.bf16.msra.mxu0 %v2936_v36 }
  0x26   : > { %2778 = vmatpush3.bf16.msra.mxu1 %v2937_v35  ;;  %692 = vmatprep.subr.bf16.mxu0 %v2938_v37 }
  0x27   : > { %2779 = vmatprep.subr.bf16.mxu1 %v2941_v38 }
  0x29   : > { %693 = vmatpush1.bf16.msra.mxu0 %v2940_v39 }
  0x2a   : > { %2780 = vmatpush3.bf16.msra.mxu1 %v2941_v38 }
  0x99   : > { %v448_v6 = vpop.xlane.xlu0 %447  ;;  %v452_v7 = vpop.xlane.xlu1 %451 }
  0x9a   : > { %v454_v8 = vmul.f32 0.0078125, %v448_v6  ;;  %v456_v9 = vmul.f32 0.0078125, %v452_v7 }
  0x9c   : > { %v3230_v10 = vsub.f32 %v442_v0, %v454_v8  ;;  %v3232_v11 = vsub.f32 %v444_v1, %v456_v9  ;;  %v535_v1 = vlaneseq }
  0x9d   : > { %v450_v12 = vpop.xlane.xlu0 %449 }
  0x9e   : > { %v455_v13 = vmul.f32 0.0078125, %v450_v12  ;;  %v460_v14 = vmul.f32 %v3230_v10, %v3230_v10  ;;  %v462_v16 = vmul.f32 %v3232_v11, %v3232_v11 }
  0xa0   : > { %v3236_v15 = vsub.f32 %v443_v2, %v455_v13  ;;  %463 = vadd.xlane.f32.xlu1 %v460_v14  ;;  %v3316_v2 = vshrl.u32 %v535_v1, 7 }
  0xa2   : > { %v461_v17 = vmul.f32 %v3236_v15, %v3236_v15  ;;  %v545_v3 = vsub.s32 2, %v3316_v2  ;;  %v537_v5 = vsub.s32 0, %v3316_v2 }
  0xa4   : > { %467 = vadd.xlane.f32.xlu1 %v462_v16  ;;  %465 = vadd.xlane.f32.xlu0 %v461_v17  ;;  %v546_v6 = vrot.slane %v533_v4, %v545_v3  ;;  %v538_v7 = vrot.slane %v533_v4, %v537_v5  ;;  %v541_v16 = vsub.s32 1, %v3316_v2 }
  0xa6   : > { %v542_v27 = vrot.slane %v533_v4, %v541_v16 }
 0x129   : > { %v464_v40 = vpop.xlane.xlu1 %463 }
 0x12a   : > { %v469_v41 = vmul.f32 0.0078125, %v464_v40 }
 0x12c   : > { %v472_v42 = vadd.f32 1e-06, %v469_v41 }
 0x12d   : > { %v468_v43 = vpop.xlane.xlu1 %467  ;;  %v466_v44 = vpop.xlane.xlu0 %465 }
 0x12e   : > { %3030 = vrsqrt.f32 %v472_v42  ;;  %v471_v45 = vmul.f32 0.0078125, %v468_v43  ;;  %v470_v46 = vmul.f32 0.0078125, %v466_v44  ;;  %v778_v44 = vand.u32 127, %v535_v1 }
 0x130   : > { %v474_v47 = vadd.f32 1e-06, %v471_v45  ;;  %v473_v48 = vadd.f32 1e-06, %v470_v46  ;;  %vm779_vm2 = vcmp.lt.s32.totalorder %v778_v44, 17 }
 0x131   : > { %v3126_v46 = vmov -1e+30  }
 0x132   : > { %3032 = vrsqrt.f32 %v474_v47  ;;  %v3360_v47 = vsel %vm779_vm2, 0.0, %v3126_v46 }
 0x133   : > { %3034 = vrsqrt.f32 %v473_v48 }
 0x13b   : > { %v3031_v49 = vpop.eup %3030 }
 0x13c   : > { %v478_v50 = vmul.f32 %v3031_v49, %v3230_v10 }
 0x13e   : > { %v487_v56 = vmul.f32 %v2537_v51, %v478_v50 }
 0x13f   : > { %v3033_v52 = vpop.eup %3032 }
 0x140   : > { %v3035_v53 = vpop.eup %3034  ;;  %v480_v54 = vmul.f32 %v3033_v52, %v3232_v11  ;;  %v496_v61 = vadd.f32 %v2538_v57, %v487_v56 }
 0x141   : > { %v479_v55 = vmul.f32 %v3035_v53, %v3236_v15 }
 0x142   : > { %v489_v58 = vmul.f32 %v2537_v51, %v480_v54 }
 0x143   : > { %v488_v59 = vmul.f32 %v2537_v51, %v479_v55 }
 0x144   : > { %v498_v60 = vadd.f32 %v2538_v57, %v489_v58 }
 0x145   : > { %v497_v62 = vadd.f32 %v2538_v57, %v488_v59 }
 0x146   : > { %v500_v63 = vpack.c.bf16 %v498_v60, %v498_v60 }
 0x147   : > { %v499_v0 = vpack.c.bf16 %v497_v62, %v496_v61 }
 0x149   : > { %711 = vmatmul.mubr.bf16.vlgmr.msra.gmra.mxu0 %v499_v0  ;;  %2781 = vmatprep.mubr.bf16.mxu1 %v499_v0 }
 0x14a   : > { %2782 = vmatmul.mubr.bf16.vlgmr.msra.gmra.mxu1 %v500_v63  ;;  %720 = vmatprep.mubr.bf16.mxu0 %v3125_v32 }
 0x151   : > { %721 = vmatmul.mubr.bf16.gmra.mxu0 %v500_v63 }
 0x209   : > { %v712_v8 = vpop.f32.mrf.mxu0 }
 0x20a   : > { %v2783_v9 = vpop.f32.mrf.mxu1  ;;  %v713_v12 = vadd.f32 %v712_v8, %v538_v7 }
 0x20b   : > { %v772_v10 = vadd.f32 %v2783_v9, %v546_v6  ;;  %v714_v11 = vpop.f32.mrf.mxu0 }
 0x20c   : > { %v763_v13 = vpop.f32.mrf.mxu1  ;;  %v781_v21 = vmul.f32 0.17677669, %v713_v12  ;;  %v715_v35 = vadd.f32 %v714_v11, %v542_v27 }
 0x20d   : > { %v3327_v14 = vpack.c.bf16 %v772_v10, %v772_v10  ;;  %v716_v15 = vpop.f32.mrf.mxu0  ;;  %v764_v24 = vadd.f32 %v763_v13, %v546_v6 }
 0x20e   : > { %v717_v17 = vadd.f32 %v716_v15, %v538_v7  ;;  %v2784_v18 = vpop.f32.mrf.mxu1 }
 0x20f   : > { %v718_v19 = vpop.f32.mrf.mxu0  ;;  %2871 = vmatprep.subr.msk.bf16.mxu1 %vm893_vm0, %v3327_v14  ;;  %v895_v20 = vsel %vm893_vm0, %v3327_v14, 0 }
 0x210   : > { %v782_v22 = vmul.f32 0.17677669, %v717_v17  ;;  %v766_v23 = vpop.f32.mrf.mxu1  ;;  %2794 = vmatpush3.bf16.msra.mxu1 %v895_v20  ;;  %v719_v31 = vadd.f32 %v718_v19, %v542_v27 }
 0x211   : > { %v767_v25 = vadd.f32 %v766_v23, %v546_v6  ;;  %v722_v26 = vpop.f32.mrf.mxu0 }
 0x212   : > { %v3336_v28 = vpack.c.bf16 %v782_v22, %v781_v21  ;;  %v3346_v38 = vpack.c.bf16 %v719_v31, %v715_v35  ;;  %v723_v40 = vadd.f32 %v722_v26, %v538_v7 }
 0x213   : > { %v3338_v29 = vpack.c.bf16 %v767_v25, %v764_v24  ;;  %v724_v30 = vpop.f32.mrf.mxu0 }
 0x214   : > { %v725_v33 = vadd.f32 %v724_v30, %v542_v27  ;;  %2789 = vmatprep.mubr.msk.bf16.mxu0 %vm790_vm1, %v3336_v28  ;;  %v798_v41 = vsel %vm790_vm1, %v3346_v38, 0  ;;  %v783_v42 = vmul.f32 0.17677669, %v723_v40 }
 0x215   : > { %v726_v34 = vpop.f32.mrf.mxu0  ;;  %2795 = vmatprep.subr.bf16.mxu1 %v3338_v29 }
 0x216   : > { %v3343_v36 = vpack.c.bf16 %v725_v33, %v725_v33  ;;  %2796 = vmatpush3.bf16.msra.mxu1 %v3338_v29  ;;  %v3356_v43 = vpack.c.bf16 %v783_v42, %v783_v42 }
 0x217   : > { %v727_v37 = vpop.f32.mrf.mxu0 }
 0x218   : > { %2869 = vmatprep.subr.msk.bf16.mxu0 %vm790_vm1, %v3343_v36  ;;  %v801_v39 = vsel %vm790_vm1, %v3343_v36, 0 }
 0x219   : > { %2786 = vmatpush3.bf16.xpose.msra.mxu0 %v801_v39 }
 0x21a   : > { %2870 = vmatprep.subr.msk.bf16.mxu0 %vm790_vm1, %v3346_v38 }
 0x221   : > { %2788 = vmatpush3.bf16.xpose.msra.mxu0 %v798_v41 }
 0x228   : > { %2790 = vmatmul.mubr.msk.bf16.vlgmr.msra.gmra.mxu0 %vm790_vm1, %v3356_v43 }
 0x2e8   : > { %v2791_v45 = vpop.f32.mrf.mxu0 }
 0x2e9   : > { %v846_v51 = vadd.f32 %v2791_v45, %v3360_v47 }
 0x2ea   : > { %v837_v48 = vpop.f32.mrf.mxu0 }
 0x2eb   : > { %v838_v49 = vadd.f32 %v837_v48, %v3360_v47  ;;  %v858_v56 = vsel %vm851_vm3, %v846_v51, -inf }
 0x2ec   : > { %v2792_v50 = vpop.f32.mrf.mxu0 }
 0x2ed   : > { %v852_v52 = vsel %vm851_vm3, %v838_v49, -inf }
 0x2ee   : > { %v840_v53 = vpop.f32.mrf.mxu0  ;;  %853 = vmax.xlane.f32.xlu0 %v852_v52 }
 0x2ef   : > { %v841_v54 = vadd.f32 %v840_v53, %v3360_v47 }
 0x2f1   : > { %v855_v55 = vsel %vm851_vm3, %v841_v54, -inf }
 0x2f2   : > { %856 = vmax.xlane.f32.xlu1 %v855_v55  ;;  %859 = vmax.xlane.f32.xlu0 %v858_v56 }
 0x377   : > { %v854_v57 = vpop.xlane.xlu0 %853 }
 0x378   : > { %v861_v58 = vsub.f32 %v838_v49, %v854_v57 }
 0x37a   : > { %v864_v59 = vmul.f32 1.442695, %v861_v58 }
 0x37b   : > { %v857_v60 = vpop.xlane.xlu1 %856  ;;  %v860_v61 = vpop.xlane.xlu0 %859 }
 0x37c   : > { %3036 = vpow2.f32 %v864_v59  ;;  %v862_v62 = vsub.f32 %v841_v54, %v857_v60  ;;  %v863_v63 = vsub.f32 %v846_v51, %v860_v61 }
 0x37e   : > { %v866_v0 = vmul.f32 1.442695, %v862_v62  ;;  %v868_v1 = vmul.f32 1.442695, %v863_v63 }
 0x380   : > { %3038 = vpow2.f32 %v866_v0 }
 0x381   : > { %3040 = vpow2.f32 %v868_v1 }
 0x389   : > { %v3037_v4 = vpop.eup %3036 }
 0x38a   : > { %v870_v6 = vsel %vm851_vm3, %v3037_v4, 0.0 }
 0x38b   : > { %871 = vadd.xlane.f32.xlu1 %v870_v6 }
 0x38d   : > { %v3039_v7 = vpop.eup %3038 }
 0x38e   : > { %v3041_v8 = vpop.eup %3040  ;;  %v873_v9 = vsel %vm851_vm3, %v3039_v7, 0.0 }
 0x38f   : > { %874 = vadd.xlane.f32.xlu0 %v873_v9  ;;  %v876_v10 = vsel %vm851_vm3, %v3041_v8, 0.0 }
 0x390   : > { %877 = vadd.xlane.f32.xlu1 %v876_v10 }
 0x3a1   : > { %953 = vrot.lane.b32.xlu1 %v3346_v38, %s3127_s16 }
 0x3a5   : > { %947 = vrot.lane.b32.xlu1 %v3336_v28, %s3127_s16  ;;  %955 = vrot.lane.b32.xlu0 %v3343_v36, %s3127_s16 }
 0x3a9   : > { %1122 = vrot.lane.b32.xlu1 %v3343_v36, %s3128_s17  ;;  %949 = vrot.lane.b32.xlu0 %v3356_v43, %s3127_s16 }
 0x3ad   : > { %1120 = vrot.lane.b32.xlu1 %v3346_v38, %s3128_s17  ;;  %1116 = vrot.lane.b32.xlu0 %v3336_v28, %s3128_s17 }
 0x3b1   : > { %1118 = vrot.lane.b32.xlu1 %v3356_v43, %s3128_s17 }
 0x414   : > { %v872_v11 = vpop.xlane.xlu1 %871 }
 0x415   : > { %3042 = vrcp.f32 %v872_v11 }
 0x418   : > { %v875_v12 = vpop.xlane.xlu0 %874 }
 0x419   : > { %v878_v13 = vpop.xlane.xlu1 %877  ;;  %3044 = vrcp.f32 %v875_v12 }
 0x41a   : > { %3046 = vrcp.f32 %v878_v13 }
 0x41c   : > { %v956_v15 = vpop.permute.xlu0 %955 }
 0x41d   : > { %2872 = vmatprep.subr.msk.bf16.mxu1 %vm790_vm1, %v956_v15  ;;  %v954_v19 = vpop.permute.xlu1 %953  ;;  %v967_v26 = vsel %vm790_vm1, %v956_v15, 0 }
 0x41e   : > { %v964_v30 = vsel %vm790_vm1, %v954_v19, 0 }
 0x420   : > { %v950_v33 = vpop.permute.xlu0 %949 }
 0x421   : > { %v948_v27 = vpop.permute.xlu1 %947 }
 0x422   : > { %v3043_v17 = vpop.eup %3042 }
 0x423   : > { %v880_v21 = vmul.f32 %v3043_v17, %v3037_v4 }
 0x424   : > { %v1117_v35 = vpop.permute.xlu0 %1116 }
 0x425   : > { %v1123_v31 = vpop.permute.xlu1 %1122 }
 0x426   : > { %v3045_v18 = vpop.eup %3044  ;;  %v1134_v34 = vsel %vm790_vm1, %v1123_v31, 0 }
 0x427   : > { %v3047_v20 = vpop.eup %3046  ;;  %v882_v22 = vmul.f32 %v3045_v18, %v3039_v7 }
 0x428   : > { %v884_v23 = vmul.f32 %v3047_v20, %v3041_v8 }
 0x429   : > { %v885_v24 = vpack.c.bf16 %v882_v22, %v880_v21  ;;  %v1121_v37 = vpop.permute.xlu1 %1120 }
 0x42a   : > { %v886_v25 = vpack.c.bf16 %v884_v23, %v884_v23  ;;  %v1131_v39 = vsel %vm790_vm1, %v1121_v37, 0 }
 0x42b   : > { %2797 = vmatprep.mubr.msk.bf16.mxu1 %vm851_vm3, %v885_v24 }
 0x42c   : > { %2798 = vmatmul.mubr.msk.bf16.vlgmr.msra.gmra.mxu1 %vm851_vm3, %v886_v25 }
 0x42d   : > { %2802 = vmatpush3.bf16.xpose.msra.mxu1 %v967_v26  ;;  %2805 = vmatprep.mubr.msk.bf16.mxu1 %vm790_vm1, %v948_v27  ;;  %v1119_v40 = vpop.permute.xlu1 %1118 }
 0x42e   : > { %2873 = vmatprep.subr.msk.bf16.mxu1 %vm790_vm1, %v954_v19 }
 0x435   : > { %2804 = vmatpush3.bf16.xpose.msra.mxu1 %v964_v30 }
 0x436   : > { %2875 = vmatprep.subr.msk.bf16.mxu1 %vm790_vm1, %v1123_v31 }
 0x43c   : > { %2806 = vmatmul.mubr.msk.bf16.vlgmr.msra.gmra.mxu1 %vm790_vm1, %v950_v33 }
 0x43d   : > { %2818 = vmatpush3.bf16.xpose.msra.mxu1 %v1134_v34  ;;  %2821 = vmatprep.mubr.msk.bf16.mxu1 %vm790_vm1, %v1117_v35 }
 0x43e   : > { %2876 = vmatprep.subr.msk.bf16.mxu1 %vm790_vm1, %v1121_v37 }
 0x445   : > { %2820 = vmatpush3.bf16.xpose.msra.mxu1 %v1131_v39 }
 0x44c   : > { %2822 = vmatmul.mubr.msk.bf16.vlgmr.msra.gmra.mxu1 %vm790_vm1, %v1119_v40 }
 0x4ec   : > { %v3401_v41 = vpop.f32.mrf.mxu1 }
 0x4ee   : > { %v3403_v42 = vpop.f32.mrf.mxu1 }
 0x4f0   : > { %v2800_v44 = vpop.f32.mrf.mxu1 }
 0x4f2   : > { %v3405_v45 = vpop.f32.mrf.mxu1 }
 0x4fc   : > { %v2807_v46 = vpop.f32.mrf.mxu1 }
 0x4fd   : > { %v1012_v18 = vadd.f32 %v2807_v46, %v3360_v47 }
 0x4fe   : > { %v1003_v48 = vpop.f32.mrf.mxu1 }
 0x4ff   : > { %v1004_v17 = vadd.f32 %v1003_v48, %v3360_v47 }
 0x500   : > { %v2808_v49 = vpop.f32.mrf.mxu1 }
 0x501   : > { %v1017_v19 = vsel %vm851_vm3, %v1004_v17, -inf }
 0x502   : > { %v1006_v50 = vpop.f32.mrf.mxu1 }
 0x503   : > { %v1007_v20 = vadd.f32 %v1006_v50, %v3360_v47 }
 0x50c   : > { %v2823_v51 = vpop.f32.mrf.mxu1 }
 0x50d   : > { %v1179_v55 = vadd.f32 %v2823_v51, %v3360_v47 }
 0x50e   : > { %v1170_v52 = vpop.f32.mrf.mxu1 }
 0x50f   : > { %v1171_v53 = vadd.f32 %v1170_v52, %v3360_v47  ;;  %v1190_v60 = vsel %vm851_vm3, %v1179_v55, -inf }
 0x510   : > { %v2824_v54 = vpop.f32.mrf.mxu1 }
 0x511   : > { %v1184_v56 = vsel %vm851_vm3, %v1171_v53, -inf }
 0x512   : > { %v1173_v57 = vpop.f32.mrf.mxu1  ;;  %1185 = vmax.xlane.f32.xlu0 %v1184_v56 }
 0x513   : > { %v1174_v58 = vadd.f32 %v1173_v57, %v3360_v47 }
 0x515   : > { %v1187_v59 = vsel %vm851_vm3, %v1174_v58, -inf }
 0x516   : > { %1188 = vmax.xlane.f32.xlu1 %v1187_v59  ;;  %1191 = vmax.xlane.f32.xlu0 %v1190_v60 }
 0x59b   : > { %v1186_v61 = vpop.xlane.xlu0 %1185 }
 0x59c   : > { %v1193_v62 = vsub.f32 %v1171_v53, %v1186_v61 }
 0x59e   : > { %v1196_v63 = vmul.f32 1.442695, %v1193_v62 }
 0x59f   : > { %v1189_v0 = vpop.xlane.xlu1 %1188  ;;  %v1192_v1 = vpop.xlane.xlu0 %1191 }
 0x5a0   : > { %3048 = vpow2.f32 %v1196_v63  ;;  %v1194_v4 = vsub.f32 %v1174_v58, %v1189_v0  ;;  %v1195_v6 = vsub.f32 %v1179_v55, %v1192_v1 }
 0x5a2   : > { %v1198_v7 = vmul.f32 1.442695, %v1194_v4  ;;  %v1200_v8 = vmul.f32 1.442695, %v1195_v6 }
 0x5a4   : > { %3050 = vpow2.f32 %v1198_v7 }
 0x5a5   : > { %3052 = vpow2.f32 %v1200_v8 }
 0x5ad   : > { %v3049_v9 = vpop.eup %3048 }
 0x5ae   : > { %v1202_v10 = vsel %vm851_vm3, %v3049_v9, 0.0 }
 0x5af   : > { %1203 = vadd.xlane.f32.xlu0 %v1202_v10 }
 0x5b1   : > { %v3051_v11 = vpop.eup %3050 }
 0x5b2   : > { %v3053_v12 = vpop.eup %3052  ;;  %v1205_v13 = vsel %vm851_vm3, %v3051_v11, 0.0 }
 0x5b3   : > { %1206 = vadd.xlane.f32.xlu0 %v1205_v13  ;;  %v1208_v15 = vsel %vm851_vm3, %v3053_v12, 0.0 }
 0x5b4   : > { %1209 = vadd.xlane.f32.xlu1 %v1208_v15 }
 0x5c5   : > { %1219 = vrot.lane.b32.xlu1 %v3338_v29, %s3128_s17 }
 0x5c9   : > { %1287 = vrot.lane.b32.xlu1 %v3343_v36, %s3129_s18  ;;  %1221 = vrot.lane.b32.xlu0 %v3327_v14, %s3128_s17  ;;  %v1023_v36 = vsel %vm851_vm3, %v1012_v18, -inf }
 0x5cd   : > { %1285 = vrot.lane.b32.xlu1 %v3346_v38, %s3129_s18  ;;  %1281 = vrot.lane.b32.xlu0 %v3336_v28, %s3129_s18  ;;  %v1020_v38 = vsel %vm851_vm3, %v1007_v20, -inf }
 0x5d1   : > { %1283 = vrot.lane.b32.xlu1 %v3356_v43, %s3129_s18 }
 0x5ec   : > { %1018 = vmax.xlane.f32.xlu0 %v1017_v19 }
 0x5f0   : > { %1024 = vmax.xlane.f32.xlu0 %v1023_v36 }
 0x5f5   : > { %1021 = vmax.xlane.f32.xlu1 %v1020_v38 }
 0x638   : > { %v1204_v21 = vpop.xlane.xlu0 %1203 }
 0x639   : > { %3054 = vrcp.f32 %v1204_v21 }
 0x63c   : > { %v1207_v28 = vpop.xlane.xlu0 %1206 }
 0x63d   : > { %v1210_v22 = vpop.xlane.xlu1 %1209  ;;  %3056 = vrcp.f32 %v1207_v28 }
 0x63e   : > { %3058 = vrcp.f32 %v1210_v22 }
 0x640   : > { %v1222_v43 = vpop.permute.xlu0 %1221 }
 0x641   : > { %v1220_v23 = vpop.permute.xlu1 %1219  ;;  %v1231_v24 = vsel %vm893_vm0, %v1222_v43, 0  ;;  %2877 = vmatprep.subr.msk.bf16.mxu1 %vm893_vm0, %v1222_v43 }
 0x642   : > { %2826 = vmatpush3.bf16.msra.mxu1 %v1231_v24 }
 0x643   : > { %2827 = vmatprep.subr.bf16.mxu1 %v1220_v23 }
 0x644   : > { %v1282_v40 = vpop.permute.xlu0 %1281 }
 0x645   : > { %v1288_v25 = vpop.permute.xlu1 %1287 }
 0x646   : > { %2828 = vmatpush3.bf16.msra.mxu1 %v1220_v23  ;;  %v3055_v26 = vpop.eup %3054  ;;  %v1299_v39 = vsel %vm790_vm1, %v1288_v25, 0 }
 0x647   : > { %2878 = vmatprep.subr.msk.bf16.mxu1 %vm790_vm1, %v1288_v25  ;;  %v1212_v31 = vmul.f32 %v3055_v26, %v3049_v9 }
 0x649   : > { %v1286_v44 = vpop.permute.xlu1 %1285 }
 0x64a   : > { %v3057_v27 = vpop.eup %3056  ;;  %v1296_v46 = vsel %vm790_vm1, %v1286_v44, 0 }
 0x64b   : > { %v3059_v30 = vpop.eup %3058  ;;  %v1214_v33 = vmul.f32 %v3057_v27, %v3051_v11 }
 0x64c   : > { %v1216_v34 = vmul.f32 %v3059_v30, %v3053_v12 }
 0x64d   : > { %v1217_v35 = vpack.c.bf16 %v1214_v33, %v1212_v31  ;;  %v1284_v48 = vpop.permute.xlu1 %1283 }
 0x64e   : > { %v1218_v37 = vpack.c.bf16 %v1216_v34, %v1216_v34 }
 0x64f   : > { %2829 = vmatprep.mubr.msk.bf16.mxu1 %vm851_vm3, %v1217_v35 }
 0x650   : > { %2830 = vmatmul.mubr.msk.bf16.vlgmr.msra.gmra.mxu1 %vm851_vm3, %v1218_v37 }
 0x651   : > { %2834 = vmatpush3.bf16.xpose.msra.mxu1 %v1299_v39  ;;  %2837 = vmatprep.mubr.msk.bf16.mxu1 %vm790_vm1, %v1282_v40 }
 0x652   : > { %2879 = vmatprep.subr.msk.bf16.mxu1 %vm790_vm1, %v1286_v44 }
 0x659   : > { %2836 = vmatpush3.bf16.xpose.msra.mxu1 %v1296_v46 }
 0x660   : > { %2838 = vmatmul.mubr.msk.bf16.vlgmr.msra.gmra.mxu1 %vm790_vm1, %v1284_v48 }
 0x661   : > { %1921 = vmatprep.mubr.bf16.mxu1 %v3125_v32 }
 0x675   : > { %v1019_v51 = vpop.xlane.xlu0 %1018 }
 0x676   : > { %v1026_v56 = vsub.f32 %v1004_v17, %v1019_v51 }
 0x678   : > { %v1029_v60 = vmul.f32 1.442695, %v1026_v56 }
 0x679   : > { %v1025_v57 = vpop.xlane.xlu0 %1024 }
 0x67a   : > { %v1028_v61 = vsub.f32 %v1012_v18, %v1025_v57 }
 0x67c   : > { %v1033_v62 = vmul.f32 1.442695, %v1028_v61 }
 0x67e   : > { %v1022_v49 = vpop.xlane.xlu1 %1021 }
 0x67f   : > { %v1027_v50 = vsub.f32 %v1007_v20, %v1022_v49 }
 0x681   : > { %v1031_v54 = vmul.f32 1.442695, %v1027_v50 }
 0x683   : > { %3060 = vpow2.f32 %v1031_v54 }
 0x684   : > { %3062 = vpow2.f32 %v1029_v60 }
 0x685   : > { %3064 = vpow2.f32 %v1033_v62 }
 0x690   : > { %v3061_v7 = vpop.eup %3060 }
 0x691   : > { %v1038_v12 = vsel %vm851_vm3, %v3061_v7, 0.0  ;;  %v3063_v15 = vpop.eup %3062 }
 0x692   : > { %v1035_v17 = vsel %vm851_vm3, %v3063_v15, 0.0  ;;  %v3065_v18 = vpop.eup %3064 }
 0x693   : > { %v1041_v19 = vsel %vm851_vm3, %v3065_v18, 0.0 }
 0x710   : > { %v3445_v52 = vpop.f32.mrf.mxu1 }
 0x712   : > { %v3447_v53 = vpop.f32.mrf.mxu1 }
 0x714   : > { %v2832_v55 = vpop.f32.mrf.mxu1 }
 0x716   : > { %v3449_v58 = vpop.f32.mrf.mxu1 }
 0x717   : > { %v2900_v59 = vpack.i.bf16 %v3449_v58, %v3447_v53 }
 0x720   : > { %v2839_v63 = vpop.f32.mrf.mxu1 }
 0x721   : > { %v1344_v0 = vadd.f32 %v2839_v63, %v3360_v47 }
 0x722   : > { %v1335_v1 = vpop.f32.mrf.mxu1 }
 0x723   : > { %v1336_v4 = vadd.f32 %v1335_v1, %v3360_v47  ;;  %v1355_v6 = vsel %vm851_vm3, %v1344_v0, -inf }
 0x724   : > { %1356 = vmax.xlane.f32.xlu1 %v1355_v6  ;;  %v2840_v8 = vpop.f32.mrf.mxu1 }
 0x725   : > { %v1349_v9 = vsel %vm851_vm3, %v1336_v4, -inf }
 0x726   : > { %v1338_v10 = vpop.f32.mrf.mxu1  ;;  %1350 = vmax.xlane.f32.xlu0 %v1349_v9  ;;  %v2942_v9 = vld [vmem:[%s3886_s5 + $0x38] sm:$0xff]  }
 0x727   : > { %v1339_v11 = vadd.f32 %v1338_v10, %v3360_v47  ;;  %v2943_v10 = vld [vmem:[%s3886_s5 + $0x30] sm:$0xff]  }
 0x728   : > { %1039 = vadd.xlane.f32.xlu1 %v1038_v12  ;;  %v2945_v12 = vld [vmem:[%s3886_s5 + $0x20] sm:$0xff]  }
 0x729   : > { %v1352_v13 = vsel %vm851_vm3, %v1339_v11, -inf }
 0x72a   : > { %1353 = vmax.xlane.f32.xlu0 %v1352_v13  ;;  %v2946_v13 = vld [vmem:[%s3886_s5 + $0x18] sm:$0xff]  }
 0x72e   : > { %1036 = vadd.xlane.f32.xlu0 %v1035_v17 }
 0x732   : > { %1042 = vadd.xlane.f32.xlu0 %v1041_v19 }
 0x7ad   : > { %v1357_v36 = vpop.xlane.xlu1 %1356 }
 0x7ae   : > { %v1360_v20 = vsub.f32 %v1344_v0, %v1357_v36 }
 0x7af   : > { %v1351_v38 = vpop.xlane.xlu0 %1350 }
 0x7b0   : > { %v1365_v21 = vmul.f32 1.442695, %v1360_v20  ;;  %v1358_v28 = vsub.f32 %v1336_v4, %v1351_v38  ;;  %v2949_v20 = vld [vmem:[%s3886_s5] sm:$0xff]  }
 0x7b1   : > { %v1040_v43 = vpop.xlane.xlu1 %1039 }
 0x7b2   : > { %3066 = vpow2.f32 %v1365_v21  ;;  %v1361_v47 = vmul.f32 1.442695, %v1358_v28 }
 0x7b3   : > { %v1354_v22 = vpop.xlane.xlu0 %1353 }
 0x7b4   : > { %3068 = vpow2.f32 %v1361_v47  ;;  %v1359_v23 = vsub.f32 %v1339_v11, %v1354_v22  ;;  %v2944_v11 = vld [vmem:[%s3886_s5 + $0x28] sm:$0xff]  }
 0x7b5   : > { %3070 = vrcp.f32 %v1040_v43 }
 0x7b6   : > { %v1363_v24 = vmul.f32 1.442695, %v1359_v23 }
 0x7b7   : > { %v1037_v25 = vpop.xlane.xlu0 %1036 }
 0x7b8   : > { %3072 = vpow2.f32 %v1363_v24 }
 0x7b9   : > { %3074 = vrcp.f32 %v1037_v25 }
 0x7bb   : > { %v1043_v46 = vpop.xlane.xlu0 %1042 }
 0x7bc   : > { %3076 = vrcp.f32 %v1043_v46 }
 0x7bf   : > { %v3067_v26 = vpop.eup %3066 }
 0x7c0   : > { %v1373_v27 = vsel %vm851_vm3, %v3067_v26, 0.0 }
 0x7c1   : > { %v3069_v30 = vpop.eup %3068  ;;  %1374 = vadd.xlane.f32.xlu1 %v1373_v27 }
 0x7c2   : > { %v3071_v31 = vpop.eup %3070  ;;  %v1367_v33 = vsel %vm851_vm3, %v3069_v30, 0.0 }
 0x7c3   : > { %v1047_v40 = vmul.f32 %v3071_v31, %v3061_v7 }
 0x7c5   : > { %v3073_v34 = vpop.eup %3072  ;;  %1368 = vadd.xlane.f32.xlu1 %v1367_v33 }
 0x7c6   : > { %v3075_v35 = vpop.eup %3074  ;;  %v1370_v37 = vsel %vm851_vm3, %v3073_v34, 0.0 }
 0x7c7   : > { %1371 = vadd.xlane.f32.xlu0 %v1370_v37  ;;  %v1045_v39 = vmul.f32 %v3075_v35, %v3063_v15  ;;  %v2947_v15 = vld [vmem:[%s3886_s5 + $0x10] sm:$0xff]  }
 0x7c9   : > { %v1050_v44 = vpack.c.bf16 %v1047_v40, %v1045_v39  ;;  %v3077_v54 = vpop.eup %3076 }
 0x7cb   : > { %2813 = vmatprep.mubr.msk.bf16.mxu0 %vm851_vm3, %v1050_v44 }
 0x7d6   : > { %1054 = vrot.lane.b32.xlu1 %v3338_v29, %s3127_s16 }
 0x7da   : > { %1386 = vrot.lane.b32.xlu1 %v3327_v14, %s3129_s18 }
 0x7dd   : > { %1056 = vrot.lane.b32.xlu0 %v3327_v14, %s3127_s16  ;;  %v1049_v14 = vmul.f32 %v3077_v54, %v3065_v18  ;;  %v2948_v18 = vld [vmem:[%s3886_s5 + $0x8] sm:$0xff]  }
 0x7de   : > { %1384 = vrot.lane.b32.xlu1 %v3338_v29, %s3129_s18 }
 0x7df   : > { %v1051_v60 = vpack.c.bf16 %v1049_v14, %v1049_v14 }
 0x84a   : > { %v1375_v48 = vpop.xlane.xlu1 %1374 }
 0x84b   : > { %3078 = vrcp.f32 %v1375_v48 }
 0x84e   : > { %v1369_v49 = vpop.xlane.xlu1 %1368 }
 0x84f   : > { %3080 = vrcp.f32 %v1369_v49 }
 0x850   : > { %v1372_v50 = vpop.xlane.xlu0 %1371 }
 0x851   : > { %3082 = vrcp.f32 %v1372_v50 }
 0x852   : > { %v1055_v51 = vpop.permute.xlu1 %1054 }
 0x854   : > { %v1057_v55 = vpop.permute.xlu0 %1056 }
 0x855   : > { %v1066_v56 = vsel %vm893_vm0, %v1057_v55, 0  ;;  %2874 = vmatprep.subr.msk.bf16.mxu0 %vm893_vm0, %v1057_v55 }
 0x856   : > { %2810 = vmatpush3.bf16.msra.mxu0 %v1066_v56  ;;  %v1387_v57 = vpop.permute.xlu1 %1386  ;;  %v2587_v56 = vld [vmem:[%s3887_s6] ss:$0 sm:$0xff] }
 0x857   : > { %2811 = vmatprep.subr.bf16.mxu0 %v1055_v51  ;;  %v1396_v62 = vsel %vm893_vm0, %v1387_v57, 0 }
 0x858   : > { %v3079_v29 = vpop.eup %3078 }
 0x859   : > { %v1381_v6 = vmul.f32 %v3079_v29, %v3067_v26 }
 0x85a   : > { %2812 = vmatpush3.bf16.msra.mxu0 %v1055_v51  ;;  %v1385_v0 = vpop.permute.xlu1 %1384 }
 0x85b   : > { %2880 = vmatprep.subr.msk.bf16.mxu0 %vm893_vm0, %v1387_v57  ;;  %v1383_v8 = vpack.c.bf16 %v1381_v6, %v1381_v6  ;;  %v3115_v57 = vld [vmem:[%s3216_s30 + $0x10] sm:$0xff] }
 0x85c   : > { %v3081_v61 = vpop.eup %3080  ;;  %v2952_v6 = vld [vmem:[%s3890_s9 + $0xe4] ss:$16 sps:$4 sm:$0xff]  }
 0x85d   : > { %2814 = vmatmul.mubr.msk.bf16.vlgmr.msra.gmra.mxu0 %vm851_vm3, %v1051_v60  ;;  %v1377_v1 = vmul.f32 %v3081_v61, %v3069_v30  ;;  %1889 = vmatprep.subr.bf16.mxu1 %v2952_v6 }
 0x85e   : > { %v3083_v63 = vpop.eup %3082  ;;  %2842 = vmatpush3.bf16.msra.mxu0 %v1396_v62  ;;  %v3116_v62 = vld [vmem:[%s3216_s30 + $0x8] sm:$0xff] }
 0x85f   : > { %2843 = vmatprep.subr.bf16.mxu0 %v1385_v0  ;;  %v1379_v4 = vmul.f32 %v3083_v63, %v3073_v34 }
 0x861   : > { %v1382_v7 = vpack.c.bf16 %v1379_v4, %v1377_v1  ;;  %v2950_v4 = vld [vmem:[%s3890_s9 + $0xe0] ss:$16 sps:$4 sm:$0xff]  }
 0x862   : > { %2844 = vmatpush3.bf16.msra.mxu0 %v1385_v0  ;;  %1890 = vmatpush1.bf16.msra.mxu1 %v2950_v4 }
 0x863   : > { %2845 = vmatprep.mubr.msk.bf16.mxu0 %vm851_vm3, %v1382_v7  ;;  %2849 = vmatprep.subr.bf16.mxu0 %v2942_v9  ;;  %v2953_v7 = vld [vmem:[%s3890_s9 + $0xe8] ss:$16 sps:$4 sm:$0xff]  }
 0x865   : > { %2846 = vmatmul.mubr.msk.bf16.vlgmr.msra.gmra.mxu0 %vm851_vm3, %v1383_v8  ;;  %v2955_v8 = vld [vmem:[%s3890_s9 + $0xec] ss:$16 sps:$4 sm:$0xff]  }
 0x866   : > { %2850 = vmatpush3.bf16.msra.mxu0 %v2942_v9 }
 0x867   : > { %2851 = vmatprep.subr.bf16.mxu0 %v2943_v10 }
 0x86a   : > { %2852 = vmatpush3.bf16.msra.mxu0 %v2943_v10 }
 0x86b   : > { %2853 = vmatprep.subr.bf16.mxu0 %v2944_v11 }
 0x86e   : > { %2854 = vmatpush3.bf16.msra.mxu0 %v2944_v11 }
 0x86f   : > { %2855 = vmatprep.subr.bf16.mxu0 %v2945_v12 }
 0x872   : > { %2856 = vmatpush3.bf16.msra.mxu0 %v2945_v12 }
 0x873   : > { %2857 = vmatprep.subr.bf16.mxu0 %v2946_v13 }
 0x876   : > { %2858 = vmatpush3.bf16.msra.mxu0 %v2946_v13 }
 0x877   : > { %2859 = vmatprep.subr.bf16.mxu0 %v2947_v15 }
 0x87a   : > { %2860 = vmatpush3.bf16.msra.mxu0 %v2947_v15 }
 0x87b   : > { %2861 = vmatprep.subr.bf16.mxu0 %v2948_v18 }
 0x87e   : > { %2862 = vmatpush3.bf16.msra.mxu0 %v2948_v18 }
 0x87f   : > { %2863 = vmatprep.subr.bf16.mxu0 %v2949_v20 }
 0x882   : > { %2864 = vmatpush3.bf16.msra.mxu0 %v2949_v20 }
 0x883   : > { %1940 = vmatprep.subr.bf16.mxu0 %v2955_v8 }
 0x91d   : > { %v2815_v17 = vpop.f32.mrf.mxu0 }
 0x91e   : > { %1453 = vrot.lane.b32.xlu1 %v2815_v17, %s3129_s18 }
 0x91f   : > { %v1102_v19 = vpop.f32.mrf.mxu0 }
 0x921   : > { %v2816_v36 = vpop.f32.mrf.mxu0 }
 0x922   : > { %1465 = vrot.lane.b32.xlu1 %v3445_v52, %s3128_s17 }
 0x923   : > { %v1105_v38 = vpop.f32.mrf.mxu0 }
 0x924   : > { %v2895_v21 = vpack.i.bf16 %v1105_v38, %v1102_v19 }
 0x925   : > { %v2847_v28 = vpop.f32.mrf.mxu0 }
 0x926   : > { %2896 = vrot.lane.b32.xlu0 %v2895_v21, %s3129_s18  ;;  %1477 = vrot.lane.b32.xlu1 %v2847_v28, %s3127_s16  ;;  %v2958_v21 = vld [vmem:[%s3890_s9 + $0xc4] ss:$16 sps:$4 sm:$0xff]   ;;  %v2961_v28 = vld [vmem:[%s3890_s9 + $0xcc] ss:$16 sps:$4 sm:$0xff]  }
 0x927   : > { %v1432_v47 = vpop.f32.mrf.mxu0  ;;  %1891 = vmatprep.subr.bf16.mxu1 %v2958_v21  ;;  %v3002_v21 = vld [vmem:[%s3892_s11 + $0x70] sm:$0xff]  }
 0x929   : > { %v2848_v22 = vpop.f32.mrf.mxu0 }
 0x92a   : > { %2901 = vrot.lane.b32.xlu0 %v2900_v59, %s3128_s17  ;;  %v2959_v22 = vld [vmem:[%s3890_s9 + $0xc8] ss:$16 sps:$4 sm:$0xff]  }
 0x92b   : > { %v1435_v43 = vpop.f32.mrf.mxu0 }
 0x92c   : > { %v2905_v23 = vpack.i.bf16 %v1435_v43, %v1432_v47  ;;  %v2956_v47 = vld [vmem:[%s3890_s9 + $0xc0] ss:$16 sps:$4 sm:$0xff]   ;;  %v2964_v43 = vld [vmem:[%s3890_s9 + $0xa4] ss:$16 sps:$4 sm:$0xff]  }
 0x92d   : > { %1892 = vmatpush1.bf16.msra.mxu1 %v2956_v47  ;;  %v3004_v47 = vld [vmem:[%s3892_s11 + $0x30] sm:$0xff]  }
 0x92e   : > { %2906 = vrot.lane.b32.xlu0 %v2905_v23, %s3127_s16  ;;  %v2967_v23 = vld [vmem:[%s3890_s9 + $0xac] ss:$16 sps:$4 sm:$0xff]   ;;  %1893 = vmatprep.subr.bf16.mxu1 %v2964_v43  ;;  %s440_s16 = scalar_lea.vmem %s3894_s13, %s2881_s27 }
 0x92f   : > { %v3006_v43 = vld [vmem:[%s3892_s11 + $0x68] sm:$0xff]  }
 0x990   : > { %v1454_v52 = vpop.permute.xlu1 %1453 }
 0x991   : > { %v1484_v34 = vsel %vm790_vm1, %v3401_v41, %v1454_v52  ;;  %v2962_v52 = vld [vmem:[%s3890_s9 + $0xa0] ss:$16 sps:$4 sm:$0xff]  }
 0x992   : > { %1894 = vmatpush1.bf16.msra.mxu1 %v2962_v52  ;;  %v3008_v52 = vld [vmem:[%s3892_s11 + $0x28] sm:$0xff]  }
 0x994   : > { %v1466_v25 = vpop.permute.xlu1 %1465 }
 0x995   : > { %v1488_v53 = vsel %vm1485_vm4, %v1484_v34, %v1466_v25  ;;  %v2968_v25 = vld [vmem:[%s3890_s9 + $0x80] ss:$16 sps:$4 sm:$0xff]  }
 0x996   : > { %v2974_v34 = vld [vmem:[%s3890_s9 + $0x60] ss:$16 sps:$4 sm:$0xff]  }
 0x998   : > { %v2897_v24 = vpop.permute.xlu0 %2896  ;;  %v1478_v35 = vpop.permute.xlu1 %1477 }
 0x999   : > { %v2899_v27 = vunpack.i.h.bf16 %v2897_v24  ;;  %v2898_v30 = vunpack.i.l.bf16 %v2897_v24  ;;  %v1492_v44 = vsel %vm1489_vm5, %v1488_v53, %v1478_v35  ;;  %v2965_v24 = vld [vmem:[%s3890_s9 + $0xa8] ss:$16 sps:$4 sm:$0xff]   ;;  %v2982_v53 = vld [vmem:[%s3890_s9 + $0x44] ss:$16 sps:$4 sm:$0xff]  }
 0x99a   : > { %v1494_v51 = vpack.c.bf16 %v1492_v44, %v1492_v44  ;;  %v2977_v35 = vld [vmem:[%s3890_s9 + $0x68] ss:$16 sps:$4 sm:$0xff]   ;;  %v2986_v44 = vld [vmem:[%s3890_s9 + $0x20] ss:$16 sps:$4 sm:$0xff]  }
 0x99b   : > { %v1483_v59 = vsel %vm790_vm1, %v3405_v45, %v2899_v27  ;;  %v1482_v37 = vsel %vm790_vm1, %v3403_v42, %v2898_v30  ;;  %v3114_v42 = vld [vmem:[%s3216_s30] sm:$0xff]  ;;  %v2971_v27 = vld [vmem:[%s3890_s9 + $0x88] ss:$16 sps:$4 sm:$0xff]   ;;  %v2973_v30 = vld [vmem:[%s3890_s9 + $0x8c] ss:$16 sps:$4 sm:$0xff]  }
 0x99c   : > { %v2902_v26 = vpop.permute.xlu0 %2901 }
 0x99d   : > { %v2904_v31 = vunpack.i.h.bf16 %v2902_v26  ;;  %v2903_v33 = vunpack.i.l.bf16 %v2902_v26  ;;  %v2970_v26 = vld [vmem:[%s3890_s9 + $0x84] ss:$16 sps:$4 sm:$0xff]  }
 0x99e   : > { %1895 = vmatprep.subr.bf16.mxu1 %v2970_v26  ;;  %v3011_v26 = vld [vmem:[%s3892_s11 + $0xe0] sm:$0xff]  }
 0x99f   : > { %v1486_v46 = vsel %vm1485_vm4, %v1482_v37, %v2903_v33  ;;  %v1487_v41 = vsel %vm1485_vm4, %v1483_v59, %v2904_v31  ;;  %v2976_v31 = vld [vmem:[%s3890_s9 + $0x64] ss:$16 sps:$4 sm:$0xff]   ;;  %v2979_v33 = vld [vmem:[%s3890_s9 + $0x6c] ss:$16 sps:$4 sm:$0xff]   ;;  %1896 = vmatpush1.bf16.msra.mxu1 %v2968_v25  ;;  %v2980_v59 = vld [vmem:[%s3890_s9 + $0x40] ss:$16 sps:$4 sm:$0xff]  }
 0x9a0   : > { %v2907_v58 = vpop.permute.xlu0 %2906  ;;  %1897 = vmatprep.subr.bf16.mxu1 %v2976_v31  ;;  %v2983_v37 = vld [vmem:[%s3890_s9 + $0x48] ss:$16 sps:$4 sm:$0xff]   ;;  %v3010_v25 = vld [vmem:[%s3892_s11 + $0x60] sm:$0xff]  }
 0x9a1   : > { %v2909_v39 = vunpack.i.h.bf16 %v2907_v58  ;;  %v2908_v40 = vunpack.i.l.bf16 %v2907_v58  ;;  %v2985_v58 = vld [vmem:[%s3890_s9 + $0x4c] ss:$16 sps:$4 sm:$0xff]  }
 0x9a2   : > { %v3014_v31 = vld [vmem:[%s3892_s11 + $0x58] sm:$0xff]  }
 0x9a3   : > { %v1490_v48 = vsel %vm1489_vm5, %v1486_v46, %v2908_v40  ;;  %v1491_v49 = vsel %vm1489_vm5, %v1487_v41, %v2909_v39  ;;  %1898 = vmatpush1.bf16.msra.mxu1 %v2974_v34  ;;  %v2988_v39 = vld [vmem:[%s3890_s9 + $0x24] ss:$16 sps:$4 sm:$0xff]   ;;  %v2991_v40 = vld [vmem:[%s3890_s9 + $0x2c] ss:$16 sps:$4 sm:$0xff]   ;;  %v2989_v46 = vld [vmem:[%s3890_s9 + $0x28] ss:$16 sps:$4 sm:$0xff]  }
 0x9a4   : > { %v1493_v50 = vpack.c.bf16 %v1491_v49, %v1490_v48  ;;  %1899 = vmatprep.subr.bf16.mxu1 %v2982_v53  ;;  %v2994_v41 = vld [vmem:[%s3890_s9 + $0x4] ss:$16 sps:$4 sm:$0xff]   ;;  %v2997_v48 = vld [vmem:[%s3890_s9 + $0xc] ss:$16 sps:$4 sm:$0xff]   ;;  %v2992_v49 = vld [vmem:[%s3890_s9] ss:$16 sps:$4 sm:$0xff]  }
 0x9a5   : > { %v3016_v34 = vld [vmem:[%s3892_s11 + $0x18] sm:$0xff]   ;;  %v3018_v53 = vld [vmem:[%s3892_s11 + $0x50] sm:$0xff]  }
 0x9a6   : > { %2865 = vmatprep.mubr.bf16.mxu0 %v1493_v50  ;;  %v2995_v50 = vld [vmem:[%s3890_s9 + $0x8] ss:$16 sps:$4 sm:$0xff]  }
 0x9a7   : > { %2866 = vmatmul.mubr.bf16.vlgmr.msra.gmra.mxu0 %v1494_v51  ;;  %1900 = vmatpush1.bf16.msra.mxu1 %v2980_v59  ;;  %v3020_v59 = vld [vmem:[%s3892_s11 + $0x10] sm:$0xff]  }
 0x9a8   : > { %1972 = vmatprep.mubr.bf16.mxu0 %v3125_v32  ;;  %1941 = vmatpush1.bf16.msra.mxu0 %v2953_v7 }
 0x9a9   : > { %1942 = vmatprep.subr.bf16.mxu0 %v2961_v28  ;;  %1901 = vmatprep.subr.bf16.mxu1 %v2988_v39  ;;  %v3003_v28 = vld [vmem:[%s3892_s11 + $0xf0] sm:$0xff]   ;;  %v3022_v39 = vld [vmem:[%s3892_s11 + $0x48] sm:$0xff]  }
 0x9ab   : > { %1902 = vmatpush1.bf16.msra.mxu1 %v2986_v44  ;;  %v3024_v44 = vld [vmem:[%s3892_s11 + $0x8] sm:$0xff]  }
 0x9ac   : > { %1943 = vmatpush1.bf16.msra.mxu0 %v2959_v22  ;;  %1903 = vmatprep.subr.bf16.mxu1 %v2994_v41  ;;  %v3005_v22 = vld [vmem:[%s3892_s11 + $0xb0] sm:$0xff]   ;;  %v3026_v41 = vld [vmem:[%s3892_s11 + $0x40] sm:$0xff]  }
 0x9ad   : > { %1944 = vmatprep.subr.bf16.mxu0 %v2967_v23  ;;  %v3007_v23 = vld [vmem:[%s3892_s11 + $0xe8] sm:$0xff]  }
 0x9af   : > { %1904 = vmatpush1.bf16.msra.mxu1 %v2992_v49  ;;  %v3028_v49 = vld [vmem:[%s3892_s11] sm:$0xff]  }
 0x9b0   : > { %1945 = vmatpush1.bf16.msra.mxu0 %v2965_v24  ;;  %v3009_v24 = vld [vmem:[%s3892_s11 + $0xa8] sm:$0xff]  }
 0x9b1   : > { %1946 = vmatprep.subr.bf16.mxu0 %v2973_v30  ;;  %v3013_v30 = vld [vmem:[%s3892_s11 + $0xa0] sm:$0xff]  }
 0x9b4   : > { %1947 = vmatpush1.bf16.msra.mxu0 %v2971_v27  ;;  %v3012_v27 = vld [vmem:[%s3892_s11 + $0x20] sm:$0xff]  }
 0x9b5   : > { %1948 = vmatprep.subr.bf16.mxu0 %v2979_v33  ;;  %v3015_v33 = vld [vmem:[%s3892_s11 + $0xd8] sm:$0xff]  }
 0x9b8   : > { %1949 = vmatpush1.bf16.msra.mxu0 %v2977_v35  ;;  %v3017_v35 = vld [vmem:[%s3892_s11 + $0x98] sm:$0xff]  }
 0x9b9   : > { %1950 = vmatprep.subr.bf16.mxu0 %v2985_v58  ;;  %v3019_v58 = vld [vmem:[%s3892_s11 + $0xd0] sm:$0xff]  }
 0x9bc   : > { %1951 = vmatpush1.bf16.msra.mxu0 %v2983_v37  ;;  %v3021_v37 = vld [vmem:[%s3892_s11 + $0x90] sm:$0xff]  }
 0x9bd   : > { %1952 = vmatprep.subr.bf16.mxu0 %v2991_v40  ;;  %v3023_v40 = vld [vmem:[%s3892_s11 + $0xc8] sm:$0xff]  }
 0x9c0   : > { %1953 = vmatpush1.bf16.msra.mxu0 %v2989_v46  ;;  %v3025_v46 = vld [vmem:[%s3892_s11 + $0x88] sm:$0xff]  }
 0x9c1   : > { %1954 = vmatprep.subr.bf16.mxu0 %v2997_v48  ;;  %v3027_v48 = vld [vmem:[%s3892_s11 + $0xc0] sm:$0xff]  }
 0x9c4   : > { %1955 = vmatpush1.bf16.msra.mxu0 %v2995_v50  ;;  %v3029_v50 = vld [vmem:[%s3892_s11 + $0x80] sm:$0xff]  }
 0xa67   : > { %v2867_v45 = vpop.f32.mrf.mxu0 }
 0xa68   : > { %v1609_v29 = vadd.f32 %v3115_v57, %v2867_v45 }
 0xa69   : > { %v1593_v54 = vpop.f32.mrf.mxu0 }
 0xa6a   : > { %v1607_v55 = vadd.f32 %v3114_v42, %v1593_v54  ;;  %v3534_v0 = vadd.f32 %v2587_v56, %v1609_v29 }
 0xa6b   : > { %v2868_v14 = vpop.f32.mrf.mxu0 }
 0xa6c   : > { %v3530_v60 = vadd.f32 %v2587_v56, %v1607_v55 }
 0xa6d   : > { %v1596_v61 = vpop.f32.mrf.mxu0 }
 0xa6e   : > { %v1608_v63 = vadd.f32 %v3116_v62, %v1596_v61  ;;  %1622 = vadd.xlane.f32.xlu0 %v3530_v60 }
 0xa70   : > { %v3536_v1 = vadd.f32 %v2587_v56, %v1608_v63  ;;  %v2588_v63 = vld [vmem:[%s3888_s7] ss:$0 sm:$0xff] }
 0xa72   : > { %1626 = vadd.xlane.f32.xlu0 %v3534_v0  ;;  %1624 = vadd.xlane.f32.xlu1 %v3536_v1 }
 0xaf7   : > { %v1623_v9 = vpop.xlane.xlu0 %1622 }
 0xaf8   : > { %v1628_v10 = vmul.f32 0.0078125, %v1623_v9  ;;  %v2589_v9 = vld [vmem:[%s3889_s8] ss:$0 sm:$0xff] }
 0xafa   : > { %v3553_v11 = vsub.f32 %v3530_v60, %v1628_v10 }
 0xafb   : > { %v1627_v12 = vpop.xlane.xlu0 %1626  ;;  %v1625_v13 = vpop.xlane.xlu1 %1624 }
 0xafc   : > { %v1630_v15 = vmul.f32 0.0078125, %v1627_v12  ;;  %v1629_v17 = vmul.f32 0.0078125, %v1625_v13  ;;  %v1634_v18 = vmul.f32 %v3553_v11, %v3553_v11 }
 0xafe   : > { %v3558_v19 = vsub.f32 %v3534_v0, %v1630_v15  ;;  %v3561_v36 = vsub.f32 %v3536_v1, %v1629_v17  ;;  %1637 = vadd.xlane.f32.xlu0 %v1634_v18 }
 0xb00   : > { %v1636_v20 = vmul.f32 %v3558_v19, %v3558_v19  ;;  %v1635_v38 = vmul.f32 %v3561_v36, %v3561_v36 }
 0xb02   : > { %1641 = vadd.xlane.f32.xlu1 %v1636_v20  ;;  %1639 = vadd.xlane.f32.xlu0 %v1635_v38  ;;  %v2998_v20 = vld [vmem:[%s3892_s11 + $0x78] sm:$0xff]  }
 0xb03   : > { %v3000_v38 = vld [vmem:[%s3892_s11 + $0x38] sm:$0xff]   ;;  %2709 = vmatprep.subr.bf16.mxu1 %v2998_v20 }
 0xb87   : > { %v1638_v51 = vpop.xlane.xlu0 %1637 }
 0xb88   : > { %v1643_v45 = vmul.f32 0.0078125, %v1638_v51  ;;  %v1707_v51 = vld [vmem:[%s3891_s10] sm:$0xf] }
 0xb8a   : > { %v1646_v54 = vadd.f32 1e-06, %v1643_v45  ;;  %v1723_v45 = vsub.s32 3, %v3316_v2 }
 0xb8b   : > { %v1640_v42 = vpop.xlane.xlu0 %1639  ;;  %v1642_v55 = vpop.xlane.xlu1 %1641 }
 0xb8c   : > { %3084 = vrsqrt.f32 %v1646_v54  ;;  %v1644_v56 = vmul.f32 0.0078125, %v1640_v42  ;;  %v1645_v14 = vmul.f32 0.0078125, %v1642_v55  ;;  %v1712_v54 = vrot.slane %v1707_v51, %v537_v5 }
 0xb8d   : > { %v3766_v42 = vrot.slane %v1707_v51, %v545_v3  ;;  %v3770_v55 = vrot.slane %v1707_v51, %v541_v16 }
 0xb8e   : > { %v1647_v57 = vadd.f32 1e-06, %v1644_v56  ;;  %v1648_v29 = vadd.f32 1e-06, %v1645_v14  ;;  %v3772_v56 = vrot.slane %v1707_v51, %v1723_v45 }
 0xb90   : > { %3086 = vrsqrt.f32 %v1647_v57 }
 0xb91   : > { %3088 = vrsqrt.f32 %v1648_v29 }
 0xb99   : > { %v3085_v61 = vpop.eup %3084 }
 0xb9a   : > { %v1652_v62 = vmul.f32 %v3085_v61, %v3553_v11 }
 0xb9c   : > { %v1661_v8 = vmul.f32 %v2588_v63, %v1652_v62 }
 0xb9d   : > { %v3087_v4 = vpop.eup %3086 }
 0xb9e   : > { %v3089_v6 = vpop.eup %3088  ;;  %v1653_v7 = vmul.f32 %v3087_v4, %v3561_v36  ;;  %v1670_v13 = vadd.f32 %v2589_v9, %v1661_v8 }
 0xb9f   : > { %v1654_v12 = vmul.f32 %v3089_v6, %v3558_v19  ;;  %v2999_v19 = vld [vmem:[%s3892_s11 + $0xf8] sm:$0xff]  }
 0xba0   : > { %v1662_v10 = vmul.f32 %v2588_v63, %v1653_v7  ;;  %2737 = vmatprep.subr.bf16.mxu0 %v2999_v19 }
 0xba1   : > { %v1663_v11 = vmul.f32 %v2588_v63, %v1654_v12 }
 0xba2   : > { %v1671_v15 = vadd.f32 %v2589_v9, %v1662_v10 }
 0xba3   : > { %v1672_v18 = vadd.f32 %v2589_v9, %v1663_v11 }
 0xba4   : > { %v1673_v17 = vpack.c.bf16 %v1671_v15, %v1670_v13 }
 0xba5   : > { %v1674_v36 = vpack.c.bf16 %v1672_v18, %v1672_v18 }
 0xba6   : > { %1922 = vmatmul.mubr.bf16.vlgmr.msra.gmra.mxu1 %v1673_v17  ;;  %1973 = vmatmul.mubr.bf16.vlgmr.msra.gmra.mxu0 %v1673_v17 }
 0xba7   : > { %1931 = vmatprep.mubr.bf16.mxu1 %v3125_v32  ;;  %1982 = vmatprep.mubr.bf16.mxu0 %v3125_v32  ;;  %v3001_v32 = vld [vmem:[%s3892_s11 + $0xb8] sm:$0xff]  }
 0xba8   : > { %2710 = vmatpush3.bf16.msra.mxu1 %v3000_v38  ;;  %2738 = vmatpush3.bf16.msra.mxu0 %v3001_v32 }
 0xba9   : > { %2711 = vmatprep.subr.bf16.mxu1 %v3002_v21  ;;  %2739 = vmatprep.subr.bf16.mxu0 %v3003_v28 }
 0xbac   : > { %2712 = vmatpush3.bf16.msra.mxu1 %v3004_v47  ;;  %2740 = vmatpush3.bf16.msra.mxu0 %v3005_v22 }
 0xbad   : > { %2713 = vmatprep.subr.bf16.mxu1 %v3006_v43  ;;  %2741 = vmatprep.subr.bf16.mxu0 %v3007_v23 }
 0xbae   : > { %1932 = vmatmul.mubr.bf16.gmra.mxu1 %v1674_v36  ;;  %1983 = vmatmul.mubr.bf16.gmra.mxu0 %v1674_v36 }
 0xbb0   : > { %2714 = vmatpush3.bf16.msra.mxu1 %v3008_v52  ;;  %2742 = vmatpush3.bf16.msra.mxu0 %v3009_v24 }
 0xbb1   : > { %2715 = vmatprep.subr.bf16.mxu1 %v3010_v25  ;;  %2743 = vmatprep.subr.bf16.mxu0 %v3011_v26 }
 0xbb4   : > { %2716 = vmatpush3.bf16.msra.mxu1 %v3012_v27  ;;  %2744 = vmatpush3.bf16.msra.mxu0 %v3013_v30 }
 0xbb5   : > { %2717 = vmatprep.subr.bf16.mxu1 %v3014_v31  ;;  %2745 = vmatprep.subr.bf16.mxu0 %v3015_v33 }
 0xbb8   : > { %2718 = vmatpush3.bf16.msra.mxu1 %v3016_v34  ;;  %2746 = vmatpush3.bf16.msra.mxu0 %v3017_v35 }
 0xbb9   : > { %2719 = vmatprep.subr.bf16.mxu1 %v3018_v53  ;;  %2747 = vmatprep.subr.bf16.mxu0 %v3019_v58 }
 0xbbc   : > { %2720 = vmatpush3.bf16.msra.mxu1 %v3020_v59  ;;  %2748 = vmatpush3.bf16.msra.mxu0 %v3021_v37 }
 0xbbd   : > { %2721 = vmatprep.subr.bf16.mxu1 %v3022_v39  ;;  %2749 = vmatprep.subr.bf16.mxu0 %v3023_v40 }
 0xbc0   : > { %2722 = vmatpush3.bf16.msra.mxu1 %v3024_v44  ;;  %2750 = vmatpush3.bf16.msra.mxu0 %v3025_v46 }
 0xbc1   : > { %2723 = vmatprep.subr.bf16.mxu1 %v3026_v41  ;;  %2751 = vmatprep.subr.bf16.mxu0 %v3027_v48 }
 0xbc4   : > { %2724 = vmatpush3.bf16.msra.mxu1 %v3028_v49  ;;  %2752 = vmatpush3.bf16.msra.mxu0 %v3029_v50 }
 0xc66   : > { %v1923_v14 = vpop.f32.mrf.mxu1  ;;  %v1974_v57 = vpop.f32.mrf.mxu0 }
 0xc67   : > { %v3774_v29 = vadd.f32 %v1923_v14, %v1712_v54  ;;  %v3777_v61 = vadd.f32 %v1974_v57, %v3766_v42 }
 0xc68   : > { %v1925_v62 = vpop.f32.mrf.mxu1  ;;  %v1976_v63 = vpop.f32.mrf.mxu0 }
 0xc69   : > { %v1991_v5 = vmul.f32 %v3774_v29, %v3774_v29  ;;  %v1993_v3 = vmul.f32 %v3777_v61, %v3777_v61  ;;  %v3784_v2 = vadd.f32 %v1925_v62, %v3770_v55  ;;  %v3787_v16 = vadd.f32 %v1976_v63, %v3772_v56 }
 0xc6a   : > { %v1927_v4 = vpop.f32.mrf.mxu1  ;;  %v1978_v6 = vpop.f32.mrf.mxu0 }
 0xc6b   : > { %v2003_v7 = vmul.f32 %v1991_v5, %v3774_v29  ;;  %v2005_v8 = vmul.f32 %v1993_v3, %v3777_v61  ;;  %v1992_v9 = vmul.f32 %v3784_v2, %v3784_v2  ;;  %v1994_v10 = vmul.f32 %v3787_v16, %v3787_v16 }
 0xc6c   : > { %v3795_v12 = vadd.f32 %v1927_v4, %v1712_v54  ;;  %v3798_v13 = vadd.f32 %v1978_v6, %v3766_v42  ;;  %v1929_v15 = vpop.f32.mrf.mxu1  ;;  %v1980_v17 = vpop.f32.mrf.mxu0 }
 0xc6d   : > { %v2015_v11 = vmul.f32 0.044715, %v2003_v7  ;;  %v2017_v18 = vmul.f32 0.044715, %v2005_v8  ;;  %v2004_v36 = vmul.f32 %v1992_v9, %v3784_v2  ;;  %v2006_v20 = vmul.f32 %v1994_v10, %v3787_v16 }
 0xc6e   : > { %v1995_v19 = vmul.f32 %v3795_v12, %v3795_v12  ;;  %v1997_v38 = vmul.f32 %v3798_v13, %v3798_v13  ;;  %v3807_v32 = vadd.f32 %v1929_v15, %v3770_v55  ;;  %v3810_v21 = vadd.f32 %v1980_v17, %v3772_v56  ;;  %v1933_v28 = vpop.f32.mrf.mxu1  ;;  %v1984_v47 = vpop.f32.mrf.mxu0 }
 0xc6f   : > { %v2027_v22 = vadd.f32 %v2015_v11, %v3774_v29  ;;  %v2029_v43 = vadd.f32 %v2017_v18, %v3777_v61  ;;  %v2016_v23 = vmul.f32 0.044715, %v2004_v36  ;;  %v2018_v52 = vmul.f32 0.044715, %v2006_v20 }
 0xc70   : > { %v2007_v24 = vmul.f32 %v1995_v19, %v3795_v12  ;;  %v2009_v25 = vmul.f32 %v1997_v38, %v3798_v13  ;;  %v1996_v26 = vmul.f32 %v3807_v32, %v3807_v32  ;;  %v1998_v27 = vmul.f32 %v3810_v21, %v3810_v21  ;;  %v1935_v30 = vpop.f32.mrf.mxu1  ;;  %v1986_v31 = vpop.f32.mrf.mxu0 }
 0xc71   : > { %v2039_v33 = vmul.f32 0.7978846, %v2027_v22  ;;  %v2041_v34 = vmul.f32 0.7978846, %v2029_v43  ;;  %v2028_v35 = vadd.f32 %v2016_v23, %v3784_v2  ;;  %v2030_v53 = vadd.f32 %v2018_v52, %v3787_v16 }
 0xc72   : > { %v2019_v58 = vmul.f32 0.044715, %v2007_v24  ;;  %v2021_v59 = vmul.f32 0.044715, %v2009_v25  ;;  %v2008_v37 = vmul.f32 %v1996_v26, %v3807_v32  ;;  %v2010_v39 = vmul.f32 %v1998_v27, %v3810_v21  ;;  %v1937_v40 = vpop.f32.mrf.mxu1  ;;  %v1988_v44 = vpop.f32.mrf.mxu0 }
 0xc73   : > { %3090 = vtanh.f32 %v2039_v33  ;;  %v2040_v46 = vmul.f32 0.7978846, %v2028_v35  ;;  %v2042_v41 = vmul.f32 0.7978846, %v2030_v53  ;;  %v3824_v48 = vadd.f32 %v1933_v28, %v1712_v54 }
 0xc74   : > { %3092 = vtanh.f32 %v2041_v34  ;;  %v2031_v49 = vadd.f32 %v2019_v58, %v3795_v12  ;;  %v2033_v50 = vadd.f32 %v2021_v59, %v3798_v13  ;;  %v2020_v51 = vmul.f32 0.044715, %v2008_v37  ;;  %v1938_v45 = vpop.f32.mrf.mxu1  ;;  %v1989_v14 = vpop.f32.mrf.mxu0 }
 0xc75   : > { %3094 = vtanh.f32 %v2040_v46  ;;  %v2022_v57 = vmul.f32 0.044715, %v2010_v39  ;;  %v1999_v62 = vmul.f32 %v3824_v48, %v3824_v48  ;;  %v3831_v63 = vadd.f32 %v1984_v47, %v3766_v42 }
 0xc76   : > { %3096 = vtanh.f32 %v2042_v41  ;;  %v2043_v5 = vmul.f32 0.7978846, %v2031_v49  ;;  %v2045_v54 = vmul.f32 0.7978846, %v2033_v50  ;;  %v2032_v3 = vadd.f32 %v2020_v51, %v3807_v32 }
 0xc77   : > { %v2034_v4 = vadd.f32 %v2022_v57, %v3810_v21  ;;  %v2011_v6 = vmul.f32 %v1999_v62, %v3824_v48  ;;  %v2001_v7 = vmul.f32 %v3831_v63, %v3831_v63  ;;  %v3839_v8 = vadd.f32 %v1935_v30, %v3770_v55 }
 0xc78   : > { %3098 = vtanh.f32 %v2043_v5  ;;  %v2044_v9 = vmul.f32 0.7978846, %v2032_v3  ;;  %v3842_v42 = vadd.f32 %v1986_v31, %v3772_v56 }
 0xc79   : > { %3100 = vtanh.f32 %v2045_v54  ;;  %v2046_v10 = vmul.f32 0.7978846, %v2034_v4  ;;  %v2023_v15 = vmul.f32 0.044715, %v2011_v6  ;;  %v2013_v17 = vmul.f32 %v2001_v7, %v3831_v63 }
 0xc7a   : > { %3102 = vtanh.f32 %v2044_v9  ;;  %v2000_v11 = vmul.f32 %v3839_v8, %v3839_v8  ;;  %v2002_v18 = vmul.f32 %v3842_v42, %v3842_v42 }
 0xc7b   : > { %3104 = vtanh.f32 %v2046_v10  ;;  %v2035_v55 = vadd.f32 %v2023_v15, %v3824_v48  ;;  %v2025_v36 = vmul.f32 0.044715, %v2013_v17 }
 0xc7c   : > { %v2012_v20 = vmul.f32 %v2000_v11, %v3839_v8  ;;  %v2014_v56 = vmul.f32 %v2002_v18, %v3842_v42 }
 0xc7d   : > { %v2047_v19 = vmul.f32 0.7978846, %v2035_v55  ;;  %v2037_v38 = vadd.f32 %v2025_v36, %v3831_v63 }
 0xc7e   : > { %v2024_v28 = vmul.f32 0.044715, %v2012_v20  ;;  %v2026_v47 = vmul.f32 0.044715, %v2014_v56 }
 0xc7f   : > { %3106 = vtanh.f32 %v2047_v19  ;;  %v2049_v22 = vmul.f32 0.7978846, %v2037_v38 }
 0xc80   : > { %v3091_v43 = vpop.eup %3090  ;;  %v2036_v23 = vadd.f32 %v2024_v28, %v3839_v8  ;;  %v2038_v52 = vadd.f32 %v2026_v47, %v3842_v42 }
 0xc81   : > { %v3093_v24 = vpop.eup %3092  ;;  %3108 = vtanh.f32 %v2049_v22  ;;  %v2063_v34 = vadd.f32 1.0, %v3091_v43 }
 0xc82   : > { %v3095_v25 = vpop.eup %3094  ;;  %v2048_v26 = vmul.f32 0.7978846, %v2036_v23  ;;  %v2050_v27 = vmul.f32 0.7978846, %v2038_v52  ;;  %v2065_v58 = vadd.f32 1.0, %v3093_v24 }
 0xc83   : > { %v3097_v30 = vpop.eup %3096  ;;  %v2064_v31 = vadd.f32 1.0, %v3095_v25  ;;  %v2075_v49 = vmul.f32 0.5, %v2063_v34 }
 0xc84   : > { %3110 = vtanh.f32 %v2048_v26  ;;  %v2066_v35 = vadd.f32 1.0, %v3097_v30  ;;  %v2077_v14 = vmul.f32 0.5, %v2065_v58 }
 0xc85   : > { %v3099_v33 = vpop.eup %3098  ;;  %3112 = vtanh.f32 %v2050_v27  ;;  %v2076_v41 = vmul.f32 0.5, %v2064_v31  ;;  %v2087_v7 = vmul.f32 %v2075_v49, %v3774_v29 }
 0xc86   : > { %v3101_v53 = vpop.eup %3100  ;;  %v2067_v59 = vadd.f32 1.0, %v3099_v33  ;;  %v2078_v45 = vmul.f32 0.5, %v2066_v35  ;;  %v2089_v11 = vmul.f32 %v2077_v14, %v3777_v61 }
 0xc87   : > { %v3103_v37 = vpop.eup %3102  ;;  %v2069_v39 = vadd.f32 1.0, %v3101_v53  ;;  %v2088_v4 = vmul.f32 %v2076_v41, %v3784_v2 }
 0xc88   : > { %v3105_v40 = vpop.eup %3104  ;;  %v2079_v44 = vmul.f32 0.5, %v2067_v59  ;;  %v2068_v46 = vadd.f32 1.0, %v3103_v37  ;;  %v2090_v9 = vmul.f32 %v2078_v45, %v3787_v16 }
 0xc89   : > { %v2081_v50 = vmul.f32 0.5, %v2069_v39  ;;  %v2070_v51 = vadd.f32 1.0, %v3105_v40 }
 0xc8a   : > { %v2080_v57 = vmul.f32 0.5, %v2068_v46  ;;  %v2091_v62 = vmul.f32 %v2079_v44, %v3795_v12 }
 0xc8b   : > { %v2082_v5 = vmul.f32 0.5, %v2070_v51  ;;  %v2093_v3 = vmul.f32 %v2081_v50, %v3798_v13 }
 0xc8c   : > { %v3107_v54 = vpop.eup %3106  ;;  %v2092_v6 = vmul.f32 %v2080_v57, %v3807_v32  ;;  %v2099_v12 = vpack.c.bf16 %v2091_v62, %v2087_v7 }
 0xc8d   : > { %v2094_v10 = vmul.f32 %v2082_v5, %v3810_v21  ;;  %v2071_v15 = vadd.f32 1.0, %v3107_v54  ;;  %v2101_v20 = vpack.c.bf16 %v2093_v3, %v2089_v11 }
 0xc8e   : > { %v3109_v17 = vpop.eup %3108  ;;  %v2100_v18 = vpack.c.bf16 %v2092_v6, %v2088_v4 }
 0xc8f   : > { %v2102_v55 = vpack.c.bf16 %v2094_v10, %v2090_v9  ;;  %v2073_v36 = vadd.f32 1.0, %v3109_v17  ;;  %v2083_v2 = vmul.f32 0.5, %v2071_v15 }
 0xc90   : > { %2395 = vmatprep.mubr.bf16.mxu1 %v2100_v18 }
 0xc91   : > { %v3111_v13 = vpop.eup %3110  ;;  %2443 = vmatprep.mubr.bf16.mxu0 %v2102_v55  ;;  %2396 = vmatmul.mubr.bf16.vlgmr.msra.gmra.mxu1 %v2099_v12  ;;  %v2085_v16 = vmul.f32 0.5, %v2073_v36  ;;  %v2095_v38 = vmul.f32 %v2083_v2, %v3824_v48 }
 0xc92   : > { %v3113_v32 = vpop.eup %3112  ;;  %2444 = vmatmul.mubr.bf16.vlgmr.msra.gmra.mxu0 %v2101_v20  ;;  %v2072_v29 = vadd.f32 1.0, %v3111_v13 }
 0xc93   : > { %v2074_v56 = vadd.f32 1.0, %v3113_v32  ;;  %v2097_v28 = vmul.f32 %v2085_v16, %v3831_v63  ;;  %v2103_v23 = vpack.c.bf16 %v2095_v38, %v2095_v38 }
 0xc94   : > { %v2084_v21 = vmul.f32 0.5, %v2072_v29 }
 0xc95   : > { %v2086_v19 = vmul.f32 0.5, %v2074_v56  ;;  %v2105_v52 = vpack.c.bf16 %v2097_v28, %v2097_v28 }
 0xc96   : > { %v2096_v61 = vmul.f32 %v2084_v21, %v3839_v8 }
 0xc97   : > { %v2098_v47 = vmul.f32 %v2086_v19, %v3842_v42  ;;  %v2654_v42 = vld [vmem:[%s3893_s12] ss:$0 sm:$0xff] }
 0xc98   : > { %v2104_v22 = vpack.c.bf16 %v2096_v61, %v2096_v61 }
 0xc99   : > { %v2106_v43 = vpack.c.bf16 %v2098_v47, %v2098_v47 }
 0xc9a   : > { %2403 = vmatprep.mubr.bf16.mxu1 %v2104_v22 }
 0xc9b   : > { %2451 = vmatprep.mubr.bf16.mxu0 %v2106_v43  ;;  %2404 = vmatmul.mubr.bf16.gmra.mxu1 %v2103_v23 }
 0xc9c   : > { %2452 = vmatmul.mubr.bf16.gmra.mxu0 %v2105_v52 }
 0xd51   : > { %v2725_v24 = vpop.f32.mrf.mxu1 }
 0xd52   : > { %v2753_v25 = vpop.f32.mrf.mxu0 }
 0xd53   : > { %v2726_v26 = vpop.f32.mrf.mxu1 }
 0xd54   : > { %v2727_v27 = vadd.f32 %v2726_v26, %v2725_v24  ;;  %v2754_v48 = vpop.f32.mrf.mxu0 }
 0xd55   : > { %v2755_v30 = vadd.f32 %v2754_v48, %v2753_v25  ;;  %v2728_v8 = vpop.f32.mrf.mxu1 }
 0xd56   : > { %v2756_v31 = vpop.f32.mrf.mxu0 }
 0xd57   : > { %v2446_v63 = vadd.f32 %v2755_v30, %v2727_v27  ;;  %v2729_v33 = vpop.f32.mrf.mxu1 }
 0xd58   : > { %v2730_v34 = vadd.f32 %v2729_v33, %v2728_v8  ;;  %v2757_v35 = vpop.f32.mrf.mxu0 }
 0xd59   : > { %v2459_v53 = vadd.f32 %v2446_v63, %v3530_v60  ;;  %v2758_v58 = vadd.f32 %v2757_v35, %v2756_v31 }
 0xd5b   : > { %v2469_v59 = vadd.f32 %v2654_v42, %v2459_v53  ;;  %v2449_v37 = vadd.f32 %v2758_v58, %v2730_v34  ;;  %v2731_v39 = vpop.f32.mrf.mxu1 }
 0xd5c   : > { %v2759_v40 = vpop.f32.mrf.mxu0 }
 0xd5d   : > { %2472 = vst [vmem:[%s440_s16] sm:$0xff] %v2469_v59  ;;  %v2460_v44 = vadd.f32 %v2449_v37, %v3536_v1  ;;  %v2732_v46 = vpop.f32.mrf.mxu1 }
 0xd5e   : > { %v2733_v41 = vadd.f32 %v2732_v46, %v2731_v39  ;;  %v2760_v49 = vpop.f32.mrf.mxu0 }
 0xd5f   : > { %v2470_v50 = vadd.f32 %v2654_v42, %v2460_v44  ;;  %v2761_v51 = vadd.f32 %v2760_v49, %v2759_v40  ;;  %v2734_v45 = vpop.f32.mrf.mxu1 }
 0xd60   : > { %v2762_v60 = vpop.f32.mrf.mxu0 }
 0xd61   : > { %2473 = vst [vmem:[%s440_s16 + $0x8] sm:$0xff] %v2470_v50  ;;  %v2454_v14 = vadd.f32 %v2761_v51, %v2733_v41  ;;  %v2735_v57 = vpop.f32.mrf.mxu1 }
 0xd62   : > { %v2763_v62 = vpop.f32.mrf.mxu0 }
 0xd63   : > { %v2461_v5 = vadd.f32 %v2454_v14, %v3534_v0 }
 0xd65   : > { %v2471_v54 = vadd.f32 %v2654_v42, %v2461_v5 }
 0xd67   : > { %2474 = vst [vmem:[%s440_s16 + $0x10] sm:$0xff] %v2471_v54 }
 0xd68 PF: > { %s23_s25 = sadd.s32 1, %s3123_s25  }
 0xd69   : > { %p20_p4 = scmp.ge.s32.totalorder %s23_s25, 4  }
 0xd6b   :  { %22 = sbr.rel (!%p20_p4) target bundleno = 1 (0x1), region = 102 }

</bundles_post_ra>
